<compile_context>
chip_gen: v7x
topology: tpu7x:2x2x1
jax: 0.10.0
libtpu: 0.0.40
codegen_flags: <defaults>
</compile_context>

<pallas_src>
import jax
import jax.numpy as jnp
from jax import lax
from jax.experimental import pallas as pl
from jax.experimental.pallas import tpu as pltpu


def _shift_rows(a, d):
    """z[r] = a[r + d] where r + d is in range, else 0.  d is a static int."""
    if d == 0:
        return a
    n, c = a.shape
    pad = jnp.zeros((abs(d), c), a.dtype)
    if d > 0:
        return jnp.concatenate([a[d:], pad], axis=0)
    return jnp.concatenate([pad, a[: n + d]], axis=0)


def _make_vgg_kernel(H, W):
    """Kernel closure over the static spatial extents (assumes H >= 2, W >= 2)."""
    HW = H * W

    def kernel(x_ref, scale_ref, bias_ref, w_ref, o_ref):
        # x_ref:     (1, H*W, Cin)   f32, one batch item per grid step
        # scale_ref: (1, Cin)        f32 folded BN scale
        # bias_ref:  (1, Cin)        f32 folded BN bias
        # w_ref:     (9*Cin, Cout)   bf16 conv weight, (kh, kw, ci)-major rows
        # o_ref:     (1, H*W, Cout)  f32
        Cin = x_ref.shape[2]

        # --- BatchNorm (folded affine, eval mode) + ReLU in f32 on the VPU ---
        y = jnp.maximum(x_ref[0] * scale_ref[...] + bias_ref[...], 0.0)  # (HW, Cin)

        # --- horizontal (kw) taps: shift along w with zero padding --------
        # Flat +/-1 row shifts wrap across image rows; the w-boundary masks
        # zero exactly those wrapped (and out-of-image) entries.
        w_pos = lax.broadcasted_iota(jnp.int32, (HW, Cin), 0) % W
        y_left = jnp.where(w_pos > 0, _shift_rows(y, -1), 0.0)       # reads w-1
        y_right = jnp.where(w_pos < W - 1, _shift_rows(y, +1), 0.0)  # reads w+1
        y_kw = (y_left, y, y_right)

        # --- channel-space im2col: 9 per-tap GEMMs accumulated in f32 -----
        # Vertical (kh) taps are flat shifts by +/-W rows; the zero fill at the
        # array ends is exactly the top/bottom SAME padding.
        w_all = w_ref[...]  # (9*Cin, Cout) bf16, resident in VMEM
        acc = None
        for kh in range(3):
            for kw in range(3):
                tap = _shift_rows(y_kw[kw], (kh - 1) * W)             # (HW, Cin)
                t = kh * 3 + kw
                part = jnp.dot(
                    tap.astype(jnp.bfloat16),
                    w_all[t * Cin:(t + 1) * Cin, :],
                    preferred_element_type=jnp.float32,
                )                                                     # (HW, Cout)
                acc = part if acc is None else acc + part
        o_ref[0] = acc.astype(o_ref.dtype)

    return kernel


def vgg_block_pallas(x_nhwc, gamma, beta, running_mean, running_var, weight,
                     eps=1e-5):
    """x_nhwc: (N, H, W, Cin); weight: (3, 3, Cin, Cout) HWIO."""
    N, H, W, Cin = x_nhwc.shape
    Cout = weight.shape[-1]
    HW = H * W

    # Fold BN running stats into one scale/bias per channel (f32).
    scale = (gamma / jnp.sqrt(running_var + eps)).astype(jnp.float32)   # (Cin,)
    bias = (beta.astype(jnp.float32) - running_mean.astype(jnp.float32) * scale)
    scale2 = scale.reshape(1, Cin)
    bias2 = bias.reshape(1, Cin)

    # Spatial-major activation layout (free reshape) and flat bf16 im2col RHS.
    x2 = x_nhwc.reshape(N, HW, Cin).astype(jnp.float32)
    w_flat = weight.astype(jnp.bfloat16).reshape(9 * Cin, Cout)          # (9*Cin, Cout)

    kernel = _make_vgg_kernel(H, W)

    out2 = pl.pallas_call(
        kernel,
        out_shape=jax.ShapeDtypeStruct((N, HW, Cout), jnp.float32),
        grid_spec=pltpu.PrefetchScalarGridSpec(
            num_scalar_prefetch=0,
            grid=(N,),
            in_specs=[
                pl.BlockSpec((1, HW, Cin), lambda b: (b, 0, 0)),
                pl.BlockSpec((1, Cin), lambda b: (0, 0)),
                pl.BlockSpec((1, Cin), lambda b: (0, 0)),
                pl.BlockSpec((9 * Cin, Cout), lambda b: (0, 0)),
            ],
            out_specs=pl.BlockSpec((1, HW, Cout), lambda b: (b, 0, 0)),
        ),
        compiler_params=pltpu.CompilerParams(
            dimension_semantics=("parallel",),
            vmem_limit_bytes=32 * 1024 * 1024,
        ),
    )(x2, scale2, bias2, w_flat)

    return out2.reshape(N, H, W, Cout)


def vgg_block_reference(x_nhwc, gamma, beta, running_mean, running_var, weight,
                        eps=1e-5):
    """Pure-JAX reference with the same bf16-operand / f32-accumulate matmul."""
    scale = gamma / jnp.sqrt(running_var + eps)
    bias = beta - running_mean * scale
    y = jnp.maximum(x_nhwc * scale + bias, 0.0)
    return lax.conv_general_dilated(
        y.astype(jnp.bfloat16), weight.astype(jnp.bfloat16),
        window_strides=(1, 1), padding="SAME",
        dimension_numbers=("NHWC", "HWIO", "NHWC"),
        preferred_element_type=jnp.float32)


if __name__ == "__main__":
    # VGGBlock(in_channels=4, out_channels=8, dimension=2)
    N, H, W, Cin, Cout = 2, 16, 16, 4, 8

    key = jax.random.PRNGKey(0)
    kx, kw_, kg, kb, km, kv = jax.random.split(key, 6)

    # PyTorch-style NCHW input, converted to the kernel's NHWC layout.
    x_nchw = jax.random.normal(kx, (N, Cin, H, W), dtype=jnp.float32)
    x_nhwc = jnp.transpose(x_nchw, (0, 2, 3, 1))

    # Deterministic synthetic parameters (shapes match the module's __init__).
    weight = 0.1 * jax.random.normal(kw_, (3, 3, Cin, Cout), dtype=jnp.float32)
    gamma = 1.0 + 0.1 * jax.random.normal(kg, (Cin,), dtype=jnp.float32)
    beta = 0.1 * jax.random.normal(kb, (Cin,), dtype=jnp.float32)
    running_mean = 0.1 * jax.random.normal(km, (Cin,), dtype=jnp.float32)
    running_var = jnp.abs(1.0 + 0.1 * jax.random.normal(kv, (Cin,),
                                                        dtype=jnp.float32))

    out = vgg_block_pallas(x_nhwc, gamma, beta, running_mean, running_var,
                           weight)
    out = jax.block_until_ready(out)

    ref = vgg_block_reference(x_nhwc, gamma, beta, running_mean, running_var,
                              weight)
    assert out.shape == (N, H, W, Cout)
    assert jnp.allclose(out, ref, atol=5e-3, rtol=5e-3)

    print("KERNEL_OK")
</pallas_src>

<mosaic_0001>
module attributes {stable_mosaic.version = 11 : i64} {
  func.func @kernel(%arg0: i32, %arg1: memref<1x256x4xf32, #tpu.memory_space<vmem>>, %arg2: memref<1x4xf32, #tpu.memory_space<vmem>>, %arg3: memref<1x4xf32, #tpu.memory_space<vmem>>, %arg4: memref<36x8xbf16, #tpu.memory_space<vmem>>, %arg5: memref<1x256x8xf32, #tpu.memory_space<vmem>>) attributes {dimension_semantics = [#tpu.dimension_semantics<parallel>], iteration_bounds = array<i64: 2>, scalar_prefetch = 0 : i64, scratch_operands = 0 : i64, tpu.core_type = #tpu.core_type<tc>, window_params = [{transform_indices = @transform_0, window_bounds = array<i64: 1, 256, 4>}, {pipeline_mode = #tpu.pipeline_mode<synchronous>, transform_indices = @transform_1, window_bounds = array<i64: 1, 4>}, {pipeline_mode = #tpu.pipeline_mode<synchronous>, transform_indices = @transform_2, window_bounds = array<i64: 1, 4>}, {pipeline_mode = #tpu.pipeline_mode<synchronous>, transform_indices = @transform_3, window_bounds = array<i64: 36, 8>}, {transform_indices = @transform_4, window_bounds = array<i64: 1, 256, 8>}]} {
    %c0 = arith.constant 0 : index
    %c0_0 = arith.constant 0 : index
    %c0_1 = arith.constant 0 : index
    %0 = vector.load %arg1[%c0, %c0_0, %c0_1] : memref<1x256x4xf32, #tpu.memory_space<vmem>>, vector<1x256x4xf32>
    %1 = vector.shape_cast %0 : vector<1x256x4xf32> to vector<256x4xf32>
    %c0_2 = arith.constant 0 : index
    %c0_3 = arith.constant 0 : index
    %2 = vector.load %arg2[%c0_2, %c0_3] : memref<1x4xf32, #tpu.memory_space<vmem>>, vector<1x4xf32>
    %3 = vector.broadcast %2 : vector<1x4xf32> to vector<256x4xf32>
    %4 = arith.mulf %1, %3 : vector<256x4xf32>
    %c0_4 = arith.constant 0 : index
    %c0_5 = arith.constant 0 : index
    %5 = vector.load %arg3[%c0_4, %c0_5] : memref<1x4xf32, #tpu.memory_space<vmem>>, vector<1x4xf32>
    %6 = vector.broadcast %5 : vector<1x4xf32> to vector<256x4xf32>
    %7 = arith.addf %4, %6 : vector<256x4xf32>
    %cst = arith.constant 0.000000e+00 : f32
    %8 = vector.broadcast %cst : f32 to vector<256x4xf32>
    %9 = arith.maximumf %7, %8 : vector<256x4xf32>
    %10 = tpu.iota {dimensions = array<i32: 0>} : vector<256x4xi32>
    %c16_i32 = arith.constant 16 : i32
    %c0_i32 = arith.constant 0 : i32
    %11 = arith.cmpi eq, %c16_i32, %c0_i32 : i32
    %c1_i32 = arith.constant 1 : i32
    %12 = arith.select %11, %c1_i32, %c16_i32 : i32
    %13 = vector.broadcast %12 : i32 to vector<256x4xi32>
    %14 = arith.remsi %10, %13 : vector<256x4xi32>
    %c0_i32_6 = arith.constant 0 : i32
    %15 = vector.broadcast %c0_i32_6 : i32 to vector<256x4xi32>
    %16 = arith.cmpi ne, %14, %15 : vector<256x4xi32>
    %c0_i32_7 = arith.constant 0 : i32
    %17 = vector.broadcast %c0_i32_7 : i32 to vector<256x4xi32>
    %18 = arith.cmpi slt, %14, %17 : vector<256x4xi32>
    %c0_i32_8 = arith.constant 0 : i32
    %19 = arith.cmpi slt, %12, %c0_i32_8 : i32
    %20 = vector.broadcast %19 : i1 to vector<256x4xi1>
    %21 = vector.broadcast %20 : vector<256x4xi1> to vector<256x4xi1>
    %22 = arith.xori %18, %21 : vector<256x4xi1>
    %23 = arith.andi %22, %16 : vector<256x4xi1>
    %24 = vector.broadcast %12 : i32 to vector<256x4xi32>
    %25 = arith.addi %14, %24 : vector<256x4xi32>
    %26 = arith.select %23, %25, %14 : vector<256x4xi1>, vector<256x4xi32>
    %c0_i32_9 = arith.constant 0 : i32
    %27 = vector.broadcast %c0_i32_9 : i32 to vector<256x4xi32>
    %28 = arith.cmpi sgt, %26, %27 : vector<256x4xi32>
    %cst_10 = arith.constant 0.000000e+00 : f32
    %29 = vector.broadcast %cst_10 : f32 to vector<1x4xf32>
    %30 = vector.extract_strided_slice %9 {offsets = [0, 0], sizes = [255, 4], strides = [1, 1]} : vector<256x4xf32> to vector<255x4xf32>
    %31 = tpu.concatenate %29, %30 in 0 : vector<1x4xf32>, vector<255x4xf32> -> vector<256x4xf32>
    %cst_11 = arith.constant 0.000000e+00 : f32
    %32 = vector.broadcast %cst_11 : f32 to vector<256x4xf32>
    %33 = arith.select %28, %31, %32 : vector<256x4xi1>, vector<256x4xf32>
    %c15_i32 = arith.constant 15 : i32
    %34 = vector.broadcast %c15_i32 : i32 to vector<256x4xi32>
    %35 = arith.cmpi slt, %26, %34 : vector<256x4xi32>
    %cst_12 = arith.constant 0.000000e+00 : f32
    %36 = vector.broadcast %cst_12 : f32 to vector<1x4xf32>
    %37 = vector.extract_strided_slice %9 {offsets = [1, 0], sizes = [255, 4], strides = [1, 1]} : vector<256x4xf32> to vector<255x4xf32>
    %38 = tpu.concatenate %37, %36 in 0 : vector<255x4xf32>, vector<1x4xf32> -> vector<256x4xf32>
    %cst_13 = arith.constant 0.000000e+00 : f32
    %39 = vector.broadcast %cst_13 : f32 to vector<256x4xf32>
    %40 = arith.select %35, %38, %39 : vector<256x4xi1>, vector<256x4xf32>
    %c0_14 = arith.constant 0 : index
    %c0_15 = arith.constant 0 : index
    %41 = vector.load %arg4[%c0_14, %c0_15] : memref<36x8xbf16, #tpu.memory_space<vmem>>, vector<36x8xbf16>
    %cst_16 = arith.constant 0.000000e+00 : f32
    %42 = vector.broadcast %cst_16 : f32 to vector<16x4xf32>
    %43 = vector.extract_strided_slice %33 {offsets = [0, 0], sizes = [240, 4], strides = [1, 1]} : vector<256x4xf32> to vector<240x4xf32>
    %44 = tpu.concatenate %42, %43 in 0 : vector<16x4xf32>, vector<240x4xf32> -> vector<256x4xf32>
    %45 = arith.truncf %44 : vector<256x4xf32> to vector<256x4xbf16>
    %46 = vector.extract_strided_slice %41 {offsets = [0, 0], sizes = [4, 8], strides = [1, 1]} : vector<36x8xbf16> to vector<4x8xbf16>
    %cst_17 = arith.constant dense<0.000000e+00> : vector<256x8xf32>
    %47 = tpu.matmul %45, %46, %cst_17 {dimension_numbers = #tpu.dot_dimension_numbers<[1], [0], [0], [1], [0, 0, 1, 1], [], []>} : vector<256x4xbf16>, vector<4x8xbf16>, vector<256x8xf32> -> vector<256x8xf32>
    %cst_18 = arith.constant 0.000000e+00 : f32
    %48 = vector.broadcast %cst_18 : f32 to vector<16x4xf32>
    %49 = vector.extract_strided_slice %9 {offsets = [0, 0], sizes = [240, 4], strides = [1, 1]} : vector<256x4xf32> to vector<240x4xf32>
    %50 = tpu.concatenate %48, %49 in 0 : vector<16x4xf32>, vector<240x4xf32> -> vector<256x4xf32>
    %51 = arith.truncf %50 : vector<256x4xf32> to vector<256x4xbf16>
    %52 = vector.extract_strided_slice %41 {offsets = [4, 0], sizes = [4, 8], strides = [1, 1]} : vector<36x8xbf16> to vector<4x8xbf16>
    %cst_19 = arith.constant dense<0.000000e+00> : vector<256x8xf32>
    %53 = tpu.matmul %51, %52, %cst_19 {dimension_numbers = #tpu.dot_dimension_numbers<[1], [0], [0], [1], [0, 0, 1, 1], [], []>} : vector<256x4xbf16>, vector<4x8xbf16>, vector<256x8xf32> -> vector<256x8xf32>
    %54 = arith.addf %47, %53 : vector<256x8xf32>
    %cst_20 = arith.constant 0.000000e+00 : f32
    %55 = vector.broadcast %cst_20 : f32 to vector<16x4xf32>
    %56 = vector.extract_strided_slice %40 {offsets = [0, 0], sizes = [240, 4], strides = [1, 1]} : vector<256x4xf32> to vector<240x4xf32>
    %57 = tpu.concatenate %55, %56 in 0 : vector<16x4xf32>, vector<240x4xf32> -> vector<256x4xf32>
    %58 = arith.truncf %57 : vector<256x4xf32> to vector<256x4xbf16>
    %59 = vector.extract_strided_slice %41 {offsets = [8, 0], sizes = [4, 8], strides = [1, 1]} : vector<36x8xbf16> to vector<4x8xbf16>
    %cst_21 = arith.constant dense<0.000000e+00> : vector<256x8xf32>
    %60 = tpu.matmul %58, %59, %cst_21 {dimension_numbers = #tpu.dot_dimension_numbers<[1], [0], [0], [1], [0, 0, 1, 1], [], []>} : vector<256x4xbf16>, vector<4x8xbf16>, vector<256x8xf32> -> vector<256x8xf32>
    %61 = arith.addf %54, %60 : vector<256x8xf32>
    %62 = arith.truncf %33 : vector<256x4xf32> to vector<256x4xbf16>
    %63 = vector.extract_strided_slice %41 {offsets = [12, 0], sizes = [4, 8], strides = [1, 1]} : vector<36x8xbf16> to vector<4x8xbf16>
    %cst_22 = arith.constant dense<0.000000e+00> : vector<256x8xf32>
    %64 = tpu.matmul %62, %63, %cst_22 {dimension_numbers = #tpu.dot_dimension_numbers<[1], [0], [0], [1], [0, 0, 1, 1], [], []>} : vector<256x4xbf16>, vector<4x8xbf16>, vector<256x8xf32> -> vector<256x8xf32>
    %65 = arith.addf %61, %64 : vector<256x8xf32>
    %66 = arith.truncf %9 : vector<256x4xf32> to vector<256x4xbf16>
    %67 = vector.extract_strided_slice %41 {offsets = [16, 0], sizes = [4, 8], strides = [1, 1]} : vector<36x8xbf16> to vector<4x8xbf16>
    %cst_23 = arith.constant dense<0.000000e+00> : vector<256x8xf32>
    %68 = tpu.matmul %66, %67, %cst_23 {dimension_numbers = #tpu.dot_dimension_numbers<[1], [0], [0], [1], [0, 0, 1, 1], [], []>} : vector<256x4xbf16>, vector<4x8xbf16>, vector<256x8xf32> -> vector<256x8xf32>
    %69 = arith.addf %65, %68 : vector<256x8xf32>
    %70 = arith.truncf %40 : vector<256x4xf32> to vector<256x4xbf16>
    %71 = vector.extract_strided_slice %41 {offsets = [20, 0], sizes = [4, 8], strides = [1, 1]} : vector<36x8xbf16> to vector<4x8xbf16>
    %cst_24 = arith.constant dense<0.000000e+00> : vector<256x8xf32>
    %72 = tpu.matmul %70, %71, %cst_24 {dimension_numbers = #tpu.dot_dimension_numbers<[1], [0], [0], [1], [0, 0, 1, 1], [], []>} : vector<256x4xbf16>, vector<4x8xbf16>, vector<256x8xf32> -> vector<256x8xf32>
    %73 = arith.addf %69, %72 : vector<256x8xf32>
    %cst_25 = arith.constant 0.000000e+00 : f32
    %74 = vector.broadcast %cst_25 : f32 to vector<16x4xf32>
    %75 = vector.extract_strided_slice %33 {offsets = [16, 0], sizes = [240, 4], strides = [1, 1]} : vector<256x4xf32> to vector<240x4xf32>
    %76 = tpu.concatenate %75, %74 in 0 : vector<240x4xf32>, vector<16x4xf32> -> vector<256x4xf32>
    %77 = arith.truncf %76 : vector<256x4xf32> to vector<256x4xbf16>
    %78 = vector.extract_strided_slice %41 {offsets = [24, 0], sizes = [4, 8], strides = [1, 1]} : vector<36x8xbf16> to vector<4x8xbf16>
    %cst_26 = arith.constant dense<0.000000e+00> : vector<256x8xf32>
    %79 = tpu.matmul %77, %78, %cst_26 {dimension_numbers = #tpu.dot_dimension_numbers<[1], [0], [0], [1], [0, 0, 1, 1], [], []>} : vector<256x4xbf16>, vector<4x8xbf16>, vector<256x8xf32> -> vector<256x8xf32>
    %80 = arith.addf %73, %79 : vector<256x8xf32>
    %cst_27 = arith.constant 0.000000e+00 : f32
    %81 = vector.broadcast %cst_27 : f32 to vector<16x4xf32>
    %82 = vector.extract_strided_slice %9 {offsets = [16, 0], sizes = [240, 4], strides = [1, 1]} : vector<256x4xf32> to vector<240x4xf32>
    %83 = tpu.concatenate %82, %81 in 0 : vector<240x4xf32>, vector<16x4xf32> -> vector<256x4xf32>
    %84 = arith.truncf %83 : vector<256x4xf32> to vector<256x4xbf16>
    %85 = vector.extract_strided_slice %41 {offsets = [28, 0], sizes = [4, 8], strides = [1, 1]} : vector<36x8xbf16> to vector<4x8xbf16>
    %cst_28 = arith.constant dense<0.000000e+00> : vector<256x8xf32>
    %86 = tpu.matmul %84, %85, %cst_28 {dimension_numbers = #tpu.dot_dimension_numbers<[1], [0], [0], [1], [0, 0, 1, 1], [], []>} : vector<256x4xbf16>, vector<4x8xbf16>, vector<256x8xf32> -> vector<256x8xf32>
    %87 = arith.addf %80, %86 : vector<256x8xf32>
    %cst_29 = arith.constant 0.000000e+00 : f32
    %88 = vector.broadcast %cst_29 : f32 to vector<16x4xf32>
    %89 = vector.extract_strided_slice %40 {offsets = [16, 0], sizes = [240, 4], strides = [1, 1]} : vector<256x4xf32> to vector<240x4xf32>
    %90 = tpu.concatenate %89, %88 in 0 : vector<240x4xf32>, vector<16x4xf32> -> vector<256x4xf32>
    %91 = arith.truncf %90 : vector<256x4xf32> to vector<256x4xbf16>
    %92 = vector.extract_strided_slice %41 {offsets = [32, 0], sizes = [4, 8], strides = [1, 1]} : vector<36x8xbf16> to vector<4x8xbf16>
    %cst_30 = arith.constant dense<0.000000e+00> : vector<256x8xf32>
    %93 = tpu.matmul %91, %92, %cst_30 {dimension_numbers = #tpu.dot_dimension_numbers<[1], [0], [0], [1], [0, 0, 1, 1], [], []>} : vector<256x4xbf16>, vector<4x8xbf16>, vector<256x8xf32> -> vector<256x8xf32>
    %94 = arith.addf %87, %93 : vector<256x8xf32>
    %c0_31 = arith.constant 0 : index
    %c0_32 = arith.constant 0 : index
    %c0_33 = arith.constant 0 : index
    %95 = vector.load %arg5[%c0_31, %c0_32, %c0_33] : memref<1x256x8xf32, #tpu.memory_space<vmem>>, vector<1x256x8xf32>
    %96 = vector.shape_cast %95 : vector<1x256x8xf32> to vector<256x8xf32>
    %97 = vector.shape_cast %94 : vector<256x8xf32> to vector<1x256x8xf32>
    tpu.vector_store %arg5[%c0_31, %c0_32, %c0_33], %97 {strides = array<i32>} : memref<1x256x8xf32, #tpu.memory_space<vmem>>, vector<1x256x8xf32>,
    return
  }
  func.func @transform_0(%arg0: i32) -> (i32, i32, i32) {
    %c0_i32 = arith.constant 0 : i32
    %c0_i32_0 = arith.constant 0 : i32
    %c0_i32_1 = arith.constant 0 : i32
    return %arg0, %c0_i32, %c0_i32_0 : i32, i32, i32
  }
  func.func @transform_1(%arg0: i32) -> (i32, i32) {
    %c0_i32 = arith.constant 0 : i32
    %c0_i32_0 = arith.constant 0 : i32
    %c0_i32_1 = arith.constant 0 : i32
    return %c0_i32, %c0_i32_0 : i32, i32
  }
  func.func @transform_2(%arg0: i32) -> (i32, i32) {
    %c0_i32 = arith.constant 0 : i32
    %c0_i32_0 = arith.constant 0 : i32
    %c0_i32_1 = arith.constant 0 : i32
    return %c0_i32, %c0_i32_0 : i32, i32
  }
  func.func @transform_3(%arg0: i32) -> (i32, i32) {
    %c0_i32 = arith.constant 0 : i32
    %c0_i32_0 = arith.constant 0 : i32
    %c0_i32_1 = arith.constant 0 : i32
    return %c0_i32, %c0_i32_0 : i32, i32
  }
  func.func @transform_4(%arg0: i32) -> (i32, i32, i32) {
    %c0_i32 = arith.constant 0 : i32
    %c0_i32_0 = arith.constant 0 : i32
    %c0_i32_1 = arith.constant 0 : i32
    return %arg0, %c0_i32, %c0_i32_0 : i32, i32, i32
  }
}

</mosaic_0001>

<bundles_post_ra>
// kernel: tpu_custom_call.1
= control target key start
LH: loop header
LB: loop body
LE: loop exit
PB: predicated region body
PF: predicated region fallthrough
CT: control target
= control target key end

     0   :  { %s4051_s15 = smov 0   ;;  %s5165_s0 = inlined_call_operand.vmem [shape: f32[2,256,4], index: 0, kind: input, shape index: {}]   ;;  %s5166_s1 = inlined_call_operand.vmem [shape: f32[1,4], index: 1, kind: input, shape index: {}]   ;;  %s5167_s2 = inlined_call_operand.vmem [shape: f32[1,4], index: 2, kind: input, shape index: {}]   ;;  %s5168_s3 = inlined_call_operand.vmem [shape: bf16[36,8], index: 3, kind: input, shape index: {}]   ;;  %s5169_s4 = inlined_call_operand.vmem [shape: f32[2,256,8], index: 4, kind: output, shape index: {}]  }
   0x1 LB: > { %s3119_s16 = sadd.s32 4294967295, %s4023_s15   ;;  %p3123_p0 = scmp.ge.s32.totalorder %s4023_s15, 1  ;;  %s4023_s15 = sphi %s4051_s15, %s14_s15  }
   0x2   : > { %p162_p1 = scmp.lt.s32.totalorder %s4023_s15, 3 }
   0x4   : > { %p163_p2 = pnand %p3123_p0, %p162_p1 }
   0x6   : > { %166 = sbr.rel (%p163_p2) target bundleno = 527 (0x20f), region = 36 }
   0xd   : > { %v1112_v0 = vld [vmem:[%s5168_s3] sm:$0xf]  ;;  %vm1201_vm0 = vcmask 1041408   ;;  %v1114_v1 = vld [vmem:[%s5168_s3 + $0x8] sm:$0xf]  ;;  %v5170_v5 = vmov 0.0|0.0   ;;  %v341_v20 = vlaneseq }
   0xe   : > { %v3130_v2 = vcombine.low %v1112_v0, %v1112_v0  ;;  %3997 = vmatprep.subr.msk.bf16.mxu0 %vm1201_vm0, %v1114_v1  ;;  %v3209_v3 = vcombine.low %v1114_v1, %v1114_v1  ;;  %v4067_v4 = vsel %vm1201_vm0, %v1114_v1, 0  ;;  %3431 = vmatprep.mubr.bf16.mxu1 %v5170_v5  ;;  %p188_p3 = scmp.lt.s32.totalorder %s3119_s16, 1  ;;  %v4079_v9 = vld [vmem:[%s5166_s1] ss:$0 sm:$0xff]  ;;  %vm1152_vm1 = vcmask 31744  }
   0xf   : > { %5210 = vst [vmem:[#allocation2_spill] sm:$0xff] %v4067_v4  ;;  %3566 = vmatpush3.bf16.msra.mxu0 %v4067_v4  ;;  %v4092_v10 = vld [vmem:[%s5167_s2] ss:$0 sm:$0xff]  ;;  %v1412_v45 = vsel %vm1201_vm0, %v1112_v0, 0  ;;  %v4138_v48 = vshrl.u32 %v341_v20, 7  ;;  %vm983_vm2 = vcmask 1046528  }
  0x10   : > { %v1151_v6 = vrot.slane %v3130_v2, 2  ;;  %s5316_s16 = smov (!%p188_p3, %s3119_s16), 1  ;;  %v2239_v7 = vrot.slane %v3209_v3, 2  ;;  %v1115_v53 = vld [vmem:[%s5168_s3 + $0xc] sm:$0xf]  ;;  %vm822_vm3 = vcmask 1040384  }
  0x11   : > { %s3274_s21 = sshll.u32 %s5316_s16, 8  ;;  %v3241_v57 = vcombine.low %v1115_v53, %v1115_v53  ;;  %v4169_v62 = vld [vmem:[%s5168_s3 + $0x4] sm:$0xf]  ;;  %v343_v2 = vadd.s32 8, %v4138_v48 }
  0x12   : > { %3993 = vmatprep.subr.msk.bf16.mxu1 %vm1201_vm0, %v1151_v6  ;;  %v1203_v8 = vsel %vm1201_vm0, %v1151_v6, 0  ;;  %3999 = vmatprep.subr.msk.bf16.mxu0 %vm1201_vm0, %v2239_v7  ;;  %s4087_s26 = scalar_lea.vmem %s5165_s0, %s3274_s21  ;;  %v2244_v50 = vsel %vm1201_vm0, %v2239_v7, 0  ;;  %v345_v6 = vadd.s32 24, %v4138_v48  ;;  %v4182_v7 = vadd.s32 40, %v4138_v48  ;;  %s5096_s13 = scalar_lea.vmem %s5169_s4, %s3274_s21 }
  0x13   : > { %3430 = vmatpush3.bf16.msra.mxu1 %v1203_v8  ;;  %v199_v11 = vld [vmem:[%s4087_s26] sm:$0xff]  ;;  %v200_v12 = vld [vmem:[%s4087_s26 + $0x8] sm:$0xff]  ;;  %v201_v13 = vld [vmem:[%s4087_s26 + $0x10] sm:$0xff]  ;;  %v4185_v8 = vadd.s32 56, %v4138_v48 }
  0x14   : > { %3994 = vmatprep.subr.msk.bf16.mxu1 %vm1201_vm0, %v1112_v0  ;;  %v238_v14 = vmul.f32 %v4079_v9, %v199_v11  ;;  %v239_v15 = vmul.f32 %v4079_v9, %v200_v12  ;;  %v202_v16 = vld [vmem:[%s4087_s26 + $0x18] sm:$0xff]  ;;  %v240_v17 = vmul.f32 %v4079_v9, %v201_v13  ;;  %v203_v18 = vld [vmem:[%s4087_s26 + $0x20] sm:$0xff]  ;;  %v204_v19 = vld [vmem:[%s4087_s26 + $0x28] sm:$0xff]  ;;  %v4193_v13 = vsel %vm1201_vm0, %v1115_v53, 0 }
  0x15   : > { %v241_v21 = vmul.f32 %v4079_v9, %v202_v16  ;;  %v242_v22 = vmul.f32 %v4079_v9, %v203_v18  ;;  %v243_v23 = vmul.f32 %v4079_v9, %v204_v19  ;;  %v205_v24 = vld [vmem:[%s4087_s26 + $0x30] sm:$0xff]  ;;  %v206_v25 = vld [vmem:[%s4087_s26 + $0x38] sm:$0xff]  ;;  %v207_v42 = vld [vmem:[%s4087_s26 + $0x40] sm:$0xff]  ;;  %v4204_v18 = vrot.slane %v3241_v57, 2 }
  0x16   : > { %v277_v26 = vadd.f32 %v4092_v10, %v238_v14  ;;  %v278_v27 = vadd.f32 %v4092_v10, %v239_v15  ;;  %v279_v28 = vadd.f32 %v4092_v10, %v240_v17  ;;  %v244_v29 = vmul.f32 %v4079_v9, %v205_v24  ;;  %v208_v43 = vld [vmem:[%s4087_s26 + $0x48] sm:$0xff]  ;;  %v209_v46 = vld [vmem:[%s4087_s26 + $0x50] sm:$0xff]  ;;  %v210_v47 = vld [vmem:[%s4087_s26 + $0x58] sm:$0xff] }
  0x17   : > { %v280_v30 = vadd.f32 %v4092_v10, %v241_v21  ;;  %v281_v31 = vadd.f32 %v4092_v10, %v242_v22  ;;  %v282_v32 = vadd.f32 %v4092_v10, %v243_v23  ;;  %v245_v33 = vmul.f32 %v4079_v9, %v206_v25  ;;  %v211_v52 = vld [vmem:[%s4087_s26 + $0x60] sm:$0xff]  ;;  %v212_v56 = vld [vmem:[%s4087_s26 + $0x68] sm:$0xff]  ;;  %v213_v17 = vld [vmem:[%s4087_s26 + $0x70] sm:$0xff]  ;;  %5214 = vst [vmem:[#allocation6_spill] sm:$0xff] %v4204_v18 }
  0x18   : > { %v4117_v34 = vmax.f32 %v277_v26, 0.0  ;;  %v4119_v35 = vmax.f32 %v278_v27, 0.0  ;;  %v4121_v36 = vmax.f32 %v279_v28, 0.0  ;;  %v283_v37 = vadd.f32 %v4092_v10, %v244_v29  ;;  %v214_v22 = vld [vmem:[%s4087_s26 + $0x78] sm:$0xff]  ;;  %v215_v23 = vld [vmem:[%s4087_s26 + $0x80] sm:$0xff]  ;;  %v216_v25 = vld [vmem:[%s4087_s26 + $0x88] sm:$0xff] }
  0x19   : > { %v4124_v38 = vmax.f32 %v280_v30, 0.0  ;;  %v4126_v39 = vmax.f32 %v281_v31, 0.0  ;;  %v4128_v40 = vmax.f32 %v282_v32, 0.0  ;;  %v284_v41 = vadd.f32 %v4092_v10, %v245_v33  ;;  %v217_v32 = vld [vmem:[%s4087_s26 + $0x90] sm:$0xff]  ;;  %v223_v5 = vld [vmem:[%s4087_s26 + $0xc0] sm:$0xff] }
  0x1a   : > { %v1133_v44 = vpack.c.bf16 %v4119_v35, %v4117_v34  ;;  %v246_v54 = vmul.f32 %v4079_v9, %v207_v42  ;;  %v247_v55 = vmul.f32 %v4079_v9, %v208_v43  ;;  %v4160_v58 = vmax.f32 %v283_v37, 0.0 }
  0x1b   : > { %v4142_v49 = vpack.c.bf16 %v4124_v38, %v4121_v36  ;;  %v4147_v51 = vpack.c.bf16 %v4128_v40, %v4126_v39  ;;  %v4162_v59 = vmax.f32 %v284_v41, 0.0  ;;  %v248_v60 = vmul.f32 %v4079_v9, %v209_v46 }
  0x1c   : > { %3432 = vmatmul.mubr.msk.bf16.vlgmr.msra.gmra.mrb[0].mxu1 %vm1152_vm1, %v1133_v44  ;;  %3567 = vmatprep.mubr.msk.bf16.mxu0 %vm1152_vm1, %v1133_v44  ;;  %v249_v61 = vmul.f32 %v4079_v9, %v210_v47  ;;  %v285_v63 = vadd.f32 %v4092_v10, %v246_v54  ;;  %v286_v0 = vadd.f32 %v4092_v10, %v247_v55  ;;  %v385_v24 = vand.u32 15, %v343_v2 }
  0x1d   : > { %5211 = vst [vmem:[#allocation3_spill] sm:$0xff] %v4142_v49  ;;  %5212 = vst [vmem:[#allocation4_spill] sm:$0xff] %v4147_v51  ;;  %3464 = vmatpush3.bf16.msra.mxu1 %v1412_v45  ;;  %3568 = vmatmul.mubr.msk.bf16.vlgmr.msra.gmra.mrb[0].mxu0 %vm1152_vm1, %v4142_v49  ;;  %v250_v1 = vmul.f32 %v4079_v9, %v211_v52  ;;  %v251_v3 = vmul.f32 %v4079_v9, %v212_v56  ;;  %v399_v26 = vand.u32 15, %v345_v6  ;;  %v218_v45 = vld [vmem:[%s4087_s26 + $0x98] sm:$0xff] }
  0x1e   : > { %3600 = vmatpush3.bf16.msra.mxu0 %v2244_v50  ;;  %3435 = vmatprep.mubr.msk.bf16.mxu1 %vm1152_vm1, %v4142_v49  ;;  %v4187_v11 = vmax.f32 %v285_v63, 0.0  ;;  %v4189_v12 = vmax.f32 %v286_v0, 0.0  ;;  %v4199_v14 = vpack.c.bf16 %v4162_v59, %v4160_v58  ;;  %v287_v15 = vadd.f32 %v4092_v10, %v248_v60  ;;  %v219_v0 = vld [vmem:[%s4087_s26 + $0xa0] sm:$0xff] }
  0x1f   : > { %3571 = vmatprep.mubr.msk.bf16.mxu0 %vm1152_vm1, %v4147_v51  ;;  %4000 = vmatprep.subr.msk.bf16.mxu0 %vm1201_vm0, %v1115_v53  ;;  %v288_v16 = vadd.f32 %v4092_v10, %v249_v61  ;;  %v289_v20 = vadd.f32 %v4092_v10, %v250_v1  ;;  %v290_v21 = vadd.f32 %v4092_v10, %v251_v3  ;;  %v413_v27 = vand.u32 15, %v4182_v7  ;;  %v220_v1 = vld [vmem:[%s4087_s26 + $0xa8] sm:$0xff] }
  0x20   : > { %3995 = vmatprep.subr.msk.bf16.mxu1 %vm1201_vm0, %v4169_v62  ;;  %5213 = vst [vmem:[#allocation5_spill] sm:$0xff] %v4199_v14  ;;  %v4208_v19 = vpack.c.bf16 %v4189_v12, %v4187_v11  ;;  %v427_v28 = vand.u32 15, %v4185_v8  ;;  %v4218_v29 = vadd.s32 72, %v4138_v48  ;;  %v989_v30 = vrot.slane %v4124_v38, 1 }
  0x21   : > { %v252_v31 = vmul.f32 %v4079_v9, %v213_v17  ;;  %v4226_v33 = vadd.s32 88, %v4138_v48  ;;  %v4229_v37 = vadd.s32 104, %v4138_v48  ;;  %v4235_v41 = vmax.f32 %v287_v15, 0.0 }
  0x22   : > { %5215 = vst [vmem:[#allocation7_spill] sm:$0xff] %v4208_v19  ;;  %v4237_v42 = vmax.f32 %v288_v16, 0.0  ;;  %v253_v43 = vmul.f32 %v4079_v9, %v214_v22  ;;  %v254_v44 = vmul.f32 %v4079_v9, %v215_v23  ;;  %v991_v46 = vrot.slane %v4126_v39, 1 }
  0x23   : > { %v4245_v47 = vmax.f32 %v289_v20, 0.0  ;;  %v4247_v50 = vmax.f32 %v290_v21, 0.0  ;;  %v255_v52 = vmul.f32 %v4079_v9, %v216_v25  ;;  %v985_v53 = vrot.slane %v4119_v35, 1 }
  0x24   : > { %3436 = vmatmul.mubr.msk.bf16.gmra.mrb[4].mxu1 %vm1152_vm1, %v4147_v51  ;;  %v987_v54 = vrot.slane %v4121_v36, 1  ;;  %v256_v55 = vmul.f32 %v4079_v9, %v217_v32  ;;  %vm4255_vm4 = vcmp.lt.s32.totalorder %v385_v24, 15  ;;  %v984_v60 = vrot.slane %v4117_v34, 1 }
  0x25   : > { %3572 = vmatmul.mubr.msk.bf16.gmra.mrb[4].mxu0 %vm1152_vm1, %v4199_v14  ;;  %3439 = vmatprep.mubr.msk.bf16.mxu1 %vm1152_vm1, %v4199_v14  ;;  %vm4260_vm5 = vcmp.lt.s32.totalorder %v399_v26, 15  ;;  %v257_v63 = vmul.f32 %v4079_v9, %v218_v45  ;;  %v4269_v2 = vpack.c.bf16 %v4237_v42, %v4235_v41  ;;  %v291_v3 = vadd.f32 %v4092_v10, %v252_v31 }
  0x26   : > { %3575 = vmatprep.mubr.msk.bf16.mxu0 %vm1152_vm1, %v4208_v19  ;;  %v292_v6 = vadd.f32 %v4092_v10, %v253_v43  ;;  %v293_v7 = vadd.f32 %v4092_v10, %v254_v44  ;;  %v5172_v15 = vrot.slane %v4117_v34, 7  ;;  %v4277_v16 = vpack.c.bf16 %v4247_v50, %v4245_v47 }
  0x27   : > { %5220 = vst [vmem:[#allocation8_spill] sm:$0xff] %v4269_v2  ;;  %v294_v17 = vadd.f32 %v4092_v10, %v255_v52  ;;  %v992_v20 = vsel %vm983_vm2, %v989_v30, %v991_v46  ;;  %v988_v21 = vsel %vm983_vm2, %v985_v53, %v987_v54  ;;  %v295_v22 = vadd.f32 %v4092_v10, %v256_v55 }
  0x28   : > { %5221 = vst [vmem:[#allocation9_spill] sm:$0xff] %v4277_v16  ;;  %v258_v23 = vmul.f32 %v4079_v9, %v219_v0  ;;  %v259_v24 = vmul.f32 %v4079_v9, %v220_v1  ;;  %v986_v25 = vsel %vm983_vm2, %v984_v60, %v985_v53  ;;  %v296_v26 = vadd.f32 %v4092_v10, %v257_v63  ;;  %v221_v53 = vld [vmem:[%s4087_s26 + $0xb0] sm:$0xff] }
  0x29   : > { %v993_v31 = vrot.slane %v4128_v40, 1  ;;  %v995_v32 = vrot.slane %v4160_v58, 1  ;;  %v4295_v43 = vmax.f32 %v291_v3, 0.0  ;;  %v4297_v44 = vmax.f32 %v292_v6, 0.0 }
  0x2a   : > { %v4299_v45 = vmax.f32 %v293_v7, 0.0  ;;  %vm4301_vm6 = vcmp.lt.s32.totalorder %v413_v27, 15  ;;  %v4308_v55 = vmax.f32 %v294_v17, 0.0  ;;  %v1081_v60 = vsel %vm4255_vm4, %v988_v21, 0.0 }
  0x2b   : > { %v990_v63 = vsel %vm983_vm2, %v987_v54, %v989_v30  ;;  %v1083_v0 = vsel %vm4260_vm5, %v992_v20, 0.0  ;;  %v4315_v1 = vmax.f32 %v295_v22, 0.0  ;;  %v297_v27 = vadd.f32 %v4092_v10, %v258_v23  ;;  %v222_v22 = vld [vmem:[%s4087_s26 + $0xb8] sm:$0xff] }
  0x2c   : > { %3440 = vmatmul.mubr.msk.bf16.gmra.mrb[8].mxu1 %vm1152_vm1, %v4208_v19  ;;  %v298_v3 = vadd.f32 %v4092_v10, %v259_v24  ;;  %v997_v6 = vrot.slane %v4162_v59, 1  ;;  %v4320_v7 = vmax.f32 %v296_v26, 0.0  ;;  %v996_v57 = vsel %vm983_vm2, %v993_v31, %v995_v32 }
  0x2d   : > { %3576 = vmatmul.mubr.msk.bf16.gmra.mrb[8].mxu0 %vm1152_vm1, %v4269_v2  ;;  %3443 = vmatprep.mubr.msk.bf16.mxu1 %vm1152_vm1, %v4269_v2  ;;  %v5173_v17 = vrot.slane %v4187_v11, 1  ;;  %v260_v30 = vmul.f32 %v4079_v9, %v221_v53  ;;  %v4329_v61 = vsel %vm822_vm3, 0.0, %v5172_v15  ;;  %v4333_v20 = vpack.c.bf16 %v4297_v44, %v4295_v43 }
  0x2e   : > { %3579 = vmatprep.mubr.msk.bf16.mxu0 %vm1152_vm1, %v4277_v16  ;;  %v4335_v21 = vpack.c.bf16 %v1081_v60, %v986_v25  ;;  %v4340_v23 = vpack.c.bf16 %v4308_v55, %v4299_v45  ;;  %v4342_v24 = vpack.c.bf16 %v1083_v0, %v990_v63  ;;  %v994_v26 = vsel %vm983_vm2, %v991_v46, %v993_v31  ;;  %v224_v25 = vld [vmem:[%s4087_s26 + $0xc8] sm:$0xff]  ;;  %v225_v46 = vld [vmem:[%s4087_s26 + $0xd0] sm:$0xff]  ;;  %v226_v31 = vld [vmem:[%s4087_s26 + $0xd8] sm:$0xff] }
  0x2f   : > { %5224 = vst [vmem:[#allocation10_spill] sm:$0xff] %v4333_v20  ;;  %vm4347_vm7 = vcmp.lt.s32.totalorder %v427_v28, 15  ;;  %v4353_v60 = vmax.f32 %v297_v27, 0.0  ;;  %v4355_v56 = vmax.f32 %v298_v3, 0.0  ;;  %v1085_v63 = vsel %vm4301_vm6, %v996_v57, 0.0  ;;  %v228_v3 = vld [vmem:[%s4087_s26 + $0xe8] sm:$0xff] }
  0x30   : > { %5225 = vst [vmem:[#allocation11_spill] sm:$0xff] %v4335_v21  ;;  %5226 = vst [vmem:[#allocation12_spill] sm:$0xff] %v4340_v23  ;;  %v4360_v0 = vsel %vm983_vm2, %v995_v32, %v997_v6  ;;  %v4368_v8 = vpack.c.bf16 %v4320_v7, %v4315_v1  ;;  %v4373_v28 = vsel %vm983_vm2, %v997_v6, %v5173_v17  ;;  %v227_v32 = vld [vmem:[%s4087_s26 + $0xe0] sm:$0xff]  ;;  %v441_v54 = vand.u32 15, %v4218_v29 }
  0x31   : > { %5227 = vst [vmem:[#allocation13_spill] sm:$0xff] %v4342_v24  ;;  %v261_v52 = vmul.f32 %v4079_v9, %v222_v22  ;;  %v299_v27 = vadd.f32 %v4092_v10, %v260_v30  ;;  %v262_v57 = vmul.f32 %v4079_v9, %v223_v5  ;;  %v263_v15 = vmul.f32 %v4079_v9, %v224_v25 }
  0x32   : > { %5230 = vst [vmem:[#allocation14_spill] sm:$0xff] %v4368_v8  ;;  %v1001_v6 = vrot.slane %v4189_v12, 1  ;;  %v1003_v30 = vrot.slane %v4235_v41, 1  ;;  %v455_v22 = vand.u32 15, %v4226_v33  ;;  %v264_v17 = vmul.f32 %v4079_v9, %v225_v46 }
  0x33   : > { %v265_v4 = vmul.f32 %v4079_v9, %v226_v31  ;;  %v1007_v5 = vrot.slane %v4245_v47, 1  ;;  %v266_v25 = vmul.f32 %v4079_v9, %v227_v32  ;;  %v267_v29 = vmul.f32 %v4079_v9, %v228_v3 }
  0x34   : > { %3444 = vmatmul.mubr.msk.bf16.gmra.mrb[12].mxu1 %vm1152_vm1, %v4277_v16  ;;  %v4399_v16 = vpack.c.bf16 %v4355_v56, %v4353_v60  ;;  %v4401_v2 = vpack.c.bf16 %v1085_v63, %v994_v26  ;;  %v1087_v33 = vsel %vm4347_vm7, %v4373_v28, 0.0  ;;  %v300_v46 = vadd.f32 %v4092_v10, %v261_v52 }
  0x35   : > { %3580 = vmatmul.mubr.msk.bf16.gmra.mrb[12].mxu0 %vm1152_vm1, %v4333_v20  ;;  %3447 = vmatprep.mubr.msk.bf16.mxu1 %vm1152_vm1, %v4333_v20  ;;  %v1005_v20 = vrot.slane %v4237_v42, 1  ;;  %v4407_v31 = vmax.f32 %v299_v27, 0.0  ;;  %v301_v19 = vadd.f32 %v4092_v10, %v262_v57  ;;  %v302_v32 = vadd.f32 %v4092_v10, %v263_v15 }
  0x36   : > { %3601 = vmatprep.mubr.msk.bf16.mxu0 %vm1152_vm1, %v4335_v21  ;;  %5231 = vst [vmem:[#allocation15_spill] sm:$0xff] %v4399_v16  ;;  %5232 = vst [vmem:[#allocation16_spill] sm:$0xff] %v4401_v2  ;;  %vm4411_vm8 = vcmp.lt.s32.totalorder %v441_v54, 15  ;;  %v1004_v14 = vsel %vm983_vm2, %v1001_v6, %v1003_v30  ;;  %vm4416_vm9 = vcmp.lt.s32.totalorder %v455_v22, 15  ;;  %v303_v53 = vadd.f32 %v4092_v10, %v264_v17 }
  0x37   : > { %v304_v63 = vadd.f32 %v4092_v10, %v265_v4  ;;  %v1008_v28 = vsel %vm983_vm2, %v1005_v20, %v1007_v5  ;;  %v305_v52 = vadd.f32 %v4092_v10, %v266_v25  ;;  %v306_v15 = vadd.f32 %v4092_v10, %v267_v29 }
  0x38   : > { %v469_v54 = vand.u32 15, %v4229_v37  ;;  %v4428_v27 = vmax.f32 %v300_v46, 0.0  ;;  %v1009_v57 = vrot.slane %v4247_v50, 1  ;;  %v1011_v22 = vrot.slane %v4295_v43, 1 }
  0x39   : > { %v357_v17 = vadd.s32 120, %v4138_v48  ;;  %v4437_v4 = vmax.f32 %v301_v19, 0.0  ;;  %v4439_v37 = vmax.f32 %v302_v32, 0.0  ;;  %v5238_v25 = vrot.slane %v4187_v11, 1 }
  0x3a   : > { %v1089_v46 = vsel %vm4411_vm8, %v1004_v14, 0.0  ;;  %v1091_v19 = vsel %vm4416_vm9, %v1008_v28, 0.0  ;;  %v4454_v32 = vmax.f32 %v304_v63, 0.0  ;;  %v4456_v51 = vmax.f32 %v305_v52, 0.0 }
  0x3b   : > { %5237 = vst [vmem:[#allocation17_spill] sm:$0xff] %v4437_v4  ;;  %v1002_v29 = vsel %vm983_vm2, %v5238_v25, %v1001_v6  ;;  %v4458_v6 = vmax.f32 %v306_v15, 0.0  ;;  %vm4460_vm10 = vcmp.lt.s32.totalorder %v469_v54, 15  ;;  %v1013_v3 = vrot.slane %v4297_v44, 1 }
  0x3c   : > { %3448 = vmatmul.mubr.msk.bf16.gmra.mrb[16].mxu1 %vm1152_vm1, %v4340_v23  ;;  %v1006_v23 = vsel %vm983_vm2, %v1003_v30, %v1005_v20  ;;  %v1012_v20 = vsel %vm983_vm2, %v1009_v57, %v1011_v22  ;;  %v483_v30 = vand.u32 15, %v357_v17  ;;  %v1015_v26 = vrot.slane %v4299_v45, 1 }
  0x3d   : > { %3602 = vmatmul.mubr.msk.bf16.vlgmr.msra.gmra.mrb[0].mxu0 %vm1152_vm1, %v4342_v24  ;;  %3451 = vmatprep.mubr.msk.bf16.mxu1 %vm1152_vm1, %v4368_v8  ;;  %v4452_v8 = vmax.f32 %v303_v53, 0.0  ;;  %v4471_v53 = vpack.c.bf16 %v1087_v33, %v4360_v0  ;;  %v4475_v63 = vpack.c.bf16 %v4428_v27, %v4407_v31  ;;  %v4477_v28 = vpack.c.bf16 %v1089_v46, %v1002_v29 }
  0x3e   : > { %3634 = vmatpush3.bf16.msra.mxu0 %v4193_v13  ;;  %3605 = vmatprep.mubr.msk.bf16.mxu0 %vm1152_vm1, %v4401_v2  ;;  %v378_v13 = vand.u32 15, %v4138_v48  ;;  %v359_v52 = vadd.s32 136, %v4138_v48  ;;  %v4482_v15 = vpack.c.bf16 %v4439_v37, %v4437_v4  ;;  %v4484_v54 = vpack.c.bf16 %v1091_v19, %v1006_v23 }
  0x3f   : > { %4001 = vmatprep.subr.msk.bf16.mxu0 %vm1201_vm0, %v4204_v18  ;;  %5241 = vst [vmem:[#allocation18_spill] sm:$0xff] %v4471_v53  ;;  %5242 = vst [vmem:[#allocation19_spill] sm:$0xff] %v4475_v63  ;;  %v4488_v17 = vpack.c.bf16 %v4454_v32, %v4452_v8  ;;  %v1010_v0 = vsel %vm983_vm2, %v1007_v5, %v1009_v57  ;;  %v4493_v33 = vpack.c.bf16 %v4458_v6, %v4456_v51 }
  0x40   : > { %5243 = vst [vmem:[#allocation20_spill] sm:$0xff] %v4477_v28  ;;  %5244 = vst [vmem:[#allocation21_spill] sm:$0xff] %v4482_v15  ;;  %v1093_v25 = vsel %vm4460_vm10, %v1012_v20, 0.0  ;;  %vm4497_vm11 = vcmp.gt.s32.totalorder %v378_v13, 0  ;;  %v5249_v23 = vrot.slane %v4119_v35, 7  ;;  %v5250_v46 = vrot.slane %v4117_v34, 7 }
  0x41   : > { %5245 = vst [vmem:[#allocation22_spill] sm:$0xff] %v4484_v54  ;;  %5246 = vst [vmem:[#allocation23_spill] sm:$0xff] %v4488_v17  ;;  %vm4508_vm12 = vcmp.lt.s32.totalorder %v483_v30, 15  ;;  %v1014_v57 = vsel %vm983_vm2, %v1011_v22, %v1013_v3  ;;  %v1016_v14 = vsel %vm983_vm2, %v1013_v3, %v1015_v26  ;;  %v497_v34 = vand.u32 15, %v359_v52 }
  0x42   : > { %v825_v19 = vsel %vm822_vm3, %v5250_v46, %v5249_v23  ;;  %v1017_v20 = vrot.slane %v4308_v55, 1  ;;  %v1019_v30 = vrot.slane %v4315_v1, 1  ;;  %v346_v23 = vadd.s32 32, %v4138_v48 }
  0x43   : > { %v919_v22 = vsel %vm4497_vm11, %v4329_v61, 0.0  ;;  %v361_v3 = vadd.s32 152, %v4138_v48  ;;  %v830_v46 = vrot.slane %v4126_v39, 7  ;;  %v5196_v13 = vrot.slane %v4128_v40, 7 }
  0x44   : > { %3452 = vmatmul.mubr.msk.bf16.gmra.mrb[20].mxu1 %vm1152_vm1, %v4399_v16  ;;  %v4530_v52 = vpack.c.bf16 %v1093_v25, %v1010_v0  ;;  %v344_v49 = vadd.s32 16, %v4138_v48  ;;  %v1095_v29 = vsel %vm4508_vm12, %v1016_v14, 0.0  ;;  %v5255_v61 = vrot.slane %v4124_v38, 7 }
  0x45   : > { %3606 = vmatmul.mubr.msk.bf16.gmra.mrb[4].mxu0 %vm1152_vm1, %v4471_v53  ;;  %3455 = vmatprep.mubr.msk.bf16.mxu1 %vm1152_vm1, %v4475_v63  ;;  %v5254_v63 = vcombine.low %v4169_v62, %v4169_v62  ;;  %v833_v39 = vsel %vm822_vm3, %v830_v46, %v5196_v13  ;;  %v363_v0 = vadd.s32 168, %v4138_v48  ;;  %v4547_v25 = vpack.c.bf16 %v825_v19, %v919_v22 }
  0x46   : > { %3609 = vmatprep.mubr.msk.bf16.mxu0 %vm1152_vm1, %v4477_v28  ;;  %5253 = vst [vmem:[#allocation24_spill] sm:$0xff] %v4530_v52  ;;  %v406_v28 = vand.u32 15, %v346_v23  ;;  %v831_v53 = vsel %vm822_vm3, %v5255_v61, %v830_v46  ;;  %vm4549_vm13 = vcmp.lt.s32.totalorder %v497_v34, 15  ;;  %v1020_v23 = vsel %vm983_vm2, %v1017_v20, %v1019_v30 }
  0x47   : > { %v4535_v16 = vrot.slane %v5254_v63, 2  ;;  %v511_v5 = vand.u32 15, %v361_v3  ;;  %v1021_v14 = vrot.slane %v4320_v7, 1  ;;  %v1023_v61 = vrot.slane %v4353_v60, 1 }
  0x48   : > { %vm762_vm14 = vcmp.gt.s32.totalorder %v406_v28, 0  ;;  %v4558_v46 = vsel %vm1201_vm0, %v4169_v62, 0  ;;  %v392_v13 = vand.u32 15, %v344_v49  ;;  %v826_v19 = vrot.slane %v4121_v36, 7 }
  0x49   : > { %v923_v2 = vsel %vm762_vm14, %v831_v53, 0.0  ;;  %v4565_v22 = vpack.c.bf16 %v1095_v29, %v1014_v57  ;;  %v1018_v28 = vsel %vm983_vm2, %v1015_v26, %v1017_v20  ;;  %v1097_v3 = vsel %vm4549_vm13, %v1020_v23, 0.0 }
  0x4a   : > { %v4561_v34 = vpack.c.bf16 %v833_v39, %v923_v2  ;;  %v525_v53 = vand.u32 15, %v363_v0  ;;  %v1025_v36 = vrot.slane %v4355_v56, 1  ;;  %v1027_v49 = vrot.slane %v4407_v31, 1 }
  0x4b   : > { %v365_v62 = vadd.s32 184, %v4138_v48  ;;  %v836_v2 = vrot.slane %v4162_v59, 7  ;;  %vm4580_vm15 = vcmp.lt.s32.totalorder %v511_v5, 15  ;;  %v1024_v57 = vsel %vm983_vm2, %v1021_v14, %v1023_v61 }
  0x4c   : > { %3456 = vmatmul.mubr.msk.bf16.gmra.mrb[24].mxu1 %vm1152_vm1, %v4482_v15  ;;  %v350_v20 = vadd.s32 64, %v4138_v48  ;;  %v838_v29 = vrot.slane %v4187_v11, 7  ;;  %vm4587_vm4 = vcmp.gt.s32.totalorder %v392_v13, 0  ;;  %v5262_v0 = vrot.slane %v4119_v35, 7 }
  0x4d   : > { %3610 = vmatmul.mubr.msk.bf16.gmra.mrb[8].mxu0 %vm1152_vm1, %v4484_v54  ;;  %3459 = vmatprep.mubr.msk.bf16.mxu1 %vm1152_vm1, %v4488_v17  ;;  %v1029_v63 = vrot.slane %v4428_v27, 1  ;;  %v840_v23 = vrot.slane %v4189_v12, 7  ;;  %vm4596_vm5 = vcmp.lt.s32.totalorder %v525_v53, 15  ;;  %v1031_v17 = vrot.slane %v4437_v4, 1 }
  0x4e   : > { %3613 = vmatprep.mubr.msk.bf16.mxu0 %vm1152_vm1, %v4530_v52  ;;  %v827_v59 = vsel %vm822_vm3, %v5262_v0, %v826_v19  ;;  %v434_v15 = vand.u32 15, %v350_v20  ;;  %v839_v11 = vsel %vm822_vm3, %v836_v2, %v838_v29  ;;  %v1028_v13 = vsel %vm983_vm2, %v1025_v36, %v1027_v49 }
  0x4f   : > { %v539_v52 = vand.u32 15, %v365_v62  ;;  %v348_v35 = vadd.s32 48, %v4138_v48  ;;  %v841_v0 = vsel %vm822_vm3, %v838_v29, %v840_v23  ;;  %v4607_v54 = vpack.c.bf16 %v1097_v3, %v1018_v28 }
  0x50   : > { %v1022_v53 = vsel %vm983_vm2, %v1019_v30, %v1021_v14  ;;  %v1099_v24 = vsel %vm4580_vm15, %v1024_v57, 0.0  ;;  %vm766_vm6 = vcmp.gt.s32.totalorder %v434_v15, 0  ;;  %v5265_v20 = vrot.slane %v4124_v38, 7  ;;  %v229_v57 = vld [vmem:[%s4087_s26 + $0xf0] sm:$0xff] }
  0x51   : > { %v921_v62 = vsel %vm4587_vm4, %v827_v59, 0.0  ;;  %v927_v4 = vsel %vm766_vm6, %v839_v11, 0.0  ;;  %v367_v18 = vadd.s32 200, %v4138_v48  ;;  %v1026_v30 = vsel %vm983_vm2, %v1023_v61, %v1025_v36 }
  0x52   : > { %v829_v21 = vsel %vm822_vm3, %v826_v19, %v5265_v20  ;;  %v1101_v14 = vsel %vm4596_vm5, %v1028_v13, 0.0  ;;  %v834_v15 = vrot.slane %v4160_v58, 7  ;;  %v4624_v38 = vpack.c.bf16 %v841_v0, %v927_v4 }
  0x53   : > { %v5266_v19 = vmov 0.0|0.0   ;;  %v4629_v28 = vpack.c.bf16 %v1099_v24, %v1022_v53  ;;  %vm4631_vm7 = vcmp.lt.s32.totalorder %v539_v52, 15  ;;  %v1032_v61 = vsel %vm983_vm2, %v1029_v63, %v1031_v17  ;;  %v230_v53 = vld [vmem:[%s4087_s26 + $0xf8] sm:$0xff] }
  0x54   : > { %3460 = vmatmul.mubr.msk.bf16.gmra.mrb[28].mxu1 %vm1152_vm1, %v4493_v33  ;;  %v420_v36 = vand.u32 15, %v348_v35  ;;  %v4638_v58 = vpack.c.bf16 %v829_v21, %v921_v62  ;;  %v1033_v4 = vrot.slane %v4439_v37, 1  ;;  %v1035_v26 = vrot.slane %v4452_v8, 1 }
  0x55   : > { %3614 = vmatmul.mubr.msk.bf16.gmra.mrb[12].mxu0 %vm1152_vm1, %v4565_v22  ;;  %3465 = vmatprep.mubr.bf16.mxu1 %v5266_v19  ;;  %v844_v24 = vrot.slane %v4237_v42, 7  ;;  %v4644_v52 = vpack.c.bf16 %v1101_v14, %v1026_v30  ;;  %v1030_v29 = vsel %vm983_vm2, %v1027_v49, %v1029_v63  ;;  %v553_v39 = vand.u32 15, %v367_v18 }
  0x56   : > { %3617 = vmatprep.mubr.msk.bf16.mxu0 %vm1152_vm1, %v4607_v54  ;;  %v354_v59 = vadd.s32 96, %v4138_v48  ;;  %v1103_v5 = vsel %vm4631_vm7, %v1032_v61, 0.0  ;;  %v5269_v21 = vrot.slane %v4128_v40, 7  ;;  %v846_v13 = vrot.slane %v4245_v47, 7 }
  0x57   : > { %v848_v35 = vrot.slane %v4247_v50, 7  ;;  %vm4655_vm8 = vcmp.gt.s32.totalorder %v420_v36, 0  ;;  %v837_v49 = vsel %vm822_vm3, %v834_v15, %v836_v2  ;;  %v268_v63 = vmul.f32 %v4079_v9, %v229_v57 }
  0x58   : > { %v835_v11 = vsel %vm822_vm3, %v5269_v21, %v834_v15  ;;  %v462_v18 = vand.u32 15, %v354_v59  ;;  %v1036_v40 = vsel %vm983_vm2, %v1033_v4, %v1035_v26  ;;  %v369_v20 = vadd.s32 216, %v4138_v48 }
  0x59   : > { %v847_v47 = vsel %vm822_vm3, %v844_v24, %v846_v13  ;;  %v849_v62 = vsel %vm822_vm3, %v846_v13, %v848_v35  ;;  %vm4672_vm9 = vcmp.lt.s32.totalorder %v553_v39, 15  ;;  %v352_v30 = vadd.s32 80, %v4138_v48 }
  0x5a   : > { %vm770_vm10 = vcmp.gt.s32.totalorder %v462_v18, 0  ;;  %v307_v14 = vadd.f32 %v4092_v10, %v268_v63  ;;  %v371_v3 = vadd.s32 232, %v4138_v48  ;;  %v269_v61 = vmul.f32 %v4079_v9, %v230_v53 }
  0x5b   : > { %v931_v15 = vsel %vm770_vm10, %v847_v47, 0.0  ;;  %v373_v36 = vadd.s32 248, %v4138_v48  ;;  %v925_v57 = vsel %vm4655_vm8, %v835_v11, 0.0  ;;  %v1034_v39 = vsel %vm983_vm2, %v1031_v17, %v1033_v4 }
  0x5c   : > { %3466 = vmatmul.mubr.msk.bf16.vlgmr.msra.gmra.mrb[0].mxu1 %vm1152_vm1, %v4547_v25  ;;  %v4689_v59 = vpack.c.bf16 %v849_v62, %v931_v15  ;;  %v4691_v21 = vmax.f32 %v307_v14, 0.0  ;;  %v567_v9 = vand.u32 15, %v369_v20  ;;  %v308_v13 = vadd.f32 %v4092_v10, %v269_v61 }
  0x5d   : > { %3498 = vmatpush3.bf16.msra.mxu1 %v4558_v46  ;;  %3618 = vmatmul.mubr.msk.bf16.gmra.mrb[16].mxu0 %vm1152_vm1, %v4629_v28  ;;  %v1037_v46 = vrot.slane %v4454_v32, 1  ;;  %v595_v18 = vand.u32 15, %v373_v36  ;;  %v1105_v11 = vsel %vm4672_vm9, %v1036_v40, 0.0  ;;  %v1039_v17 = vrot.slane %v4456_v51, 1 }
  0x5e   : > { %3469 = vmatprep.mubr.msk.bf16.mxu1 %vm1152_vm1, %v4638_v58  ;;  %3621 = vmatprep.mubr.msk.bf16.mxu0 %vm1152_vm1, %v4644_v52  ;;  %v448_v4 = vand.u32 15, %v352_v30  ;;  %v842_v0 = vrot.slane %v4235_v41, 7  ;;  %v581_v63 = vand.u32 15, %v371_v3  ;;  %v1041_v53 = vrot.slane %v4458_v6, 1 }
  0x5f   : > { %3996 = vmatprep.subr.msk.bf16.mxu1 %vm1201_vm0, %v4535_v16  ;;  %v1043_v20 = vrot.slane %v4691_v21, 1  ;;  %v4707_v47 = vmax.f32 %v308_v13, 0.0  ;;  %v4709_v10 = vpack.c.bf16 %v1103_v5, %v1030_v29  ;;  %v4711_v62 = vpack.c.bf16 %v837_v49, %v925_v57 }
  0x60   : > { %v4713_v40 = vpack.c.bf16 %v1105_v11, %v1034_v39  ;;  %vm4715_vm11 = vcmp.lt.s32.totalorder %v567_v9, 15  ;;  %vm4719_vm12 = vcmp.lt.s32.totalorder %v595_v18, 15  ;;  %v1040_v14 = vsel %vm983_vm2, %v1037_v46, %v1039_v17 }
  0x61   : > { %v1045_v30 = vrot.slane %v4707_v47, 1  ;;  %vm4725_vm13 = vcmp.gt.s32.totalorder %v448_v4, 0  ;;  %v843_v29 = vsel %vm822_vm3, %v840_v23, %v842_v0  ;;  %v356_v5 = vadd.s32 112, %v4138_v48 }
  0x62   : > { %vm4735_vm14 = vcmp.lt.s32.totalorder %v581_v63, 15  ;;  %v1044_v3 = vsel %vm983_vm2, %v1041_v53, %v1043_v20  ;;  %v1038_v12 = vsel %vm983_vm2, %v1035_v26, %v1037_v46  ;;  %v1107_v57 = vsel %vm4715_vm11, %v1040_v14, 0.0 }
  0x63   : > { %v1046_v61 = vsel %vm983_vm2, %v1043_v20, %v1045_v30  ;;  %v1079_v36 = vsel %vm983_vm2, %v1045_v30, 0.0  ;;  %v845_v39 = vsel %vm822_vm3, %v842_v0, %v844_v24  ;;  %v929_v9 = vsel %vm4725_vm13, %v843_v29, 0.0 }
  0x64   : > { %3470 = vmatmul.mubr.msk.bf16.gmra.mrb[4].mxu1 %vm1152_vm1, %v4561_v34  ;;  %v1111_v23 = vsel %vm4719_vm12, %v1079_v36, 0.0  ;;  %v1042_v26 = vsel %vm983_vm2, %v1039_v17, %v1041_v53  ;;  %v1109_v46 = vsel %vm4735_vm14, %v1044_v3, 0.0  ;;  %v476_v18 = vand.u32 15, %v356_v5 }
  0x65   : > { %3622 = vmatmul.mubr.msk.bf16.gmra.mrb[20].mxu0 %vm1152_vm1, %v4709_v10  ;;  %3473 = vmatprep.mubr.msk.bf16.mxu1 %vm1152_vm1, %v4711_v62  ;;  %v4760_v13 = vpack.c.bf16 %v1111_v23, %v1046_v61  ;;  %v850_v11 = vrot.slane %v4295_v43, 7  ;;  %v4766_v4 = vpack.c.bf16 %v1107_v57, %v1038_v12  ;;  %v4768_v63 = vpack.c.bf16 %v845_v39, %v929_v9 }
  0x66   : > { %3625 = vmatprep.mubr.msk.bf16.mxu0 %vm1152_vm1, %v4713_v40  ;;  %v358_v42 = vadd.s32 128, %v4138_v48  ;;  %v4771_v24 = vpack.c.bf16 %v1109_v46, %v1042_v26  ;;  %v852_v0 = vrot.slane %v4297_v44, 7  ;;  %vm772_vm15 = vcmp.gt.s32.totalorder %v476_v18, 0 }
  0x67   : > { %v851_v17 = vsel %vm822_vm3, %v848_v35, %v850_v11  ;;  %v360_v53 = vadd.s32 144, %v4138_v48  ;;  %v854_v43 = vrot.slane %v4299_v45, 7  ;;  %v858_v2 = vrot.slane %v4315_v1, 7 }
  0x68   : > { %v490_v20 = vand.u32 15, %v358_v42  ;;  %v853_v50 = vsel %vm822_vm3, %v850_v11, %v852_v0  ;;  %v933_v44 = vsel %vm772_vm15, %v851_v17, 0.0  ;;  %v856_v45 = vrot.slane %v4308_v55, 7 }
  0x69   : > { %v504_v35 = vand.u32 15, %v360_v53  ;;  %v855_v41 = vsel %vm822_vm3, %v852_v0, %v854_v43  ;;  %v4791_v30 = vpack.c.bf16 %v853_v50, %v933_v44  ;;  %v860_v15 = vrot.slane %v4320_v7, 7 }
  0x6a   : > { %vm4793_vm2 = vcmp.gt.s32.totalorder %v490_v20, 0  ;;  %v372_v29 = vadd.s32 240, %v4138_v48  ;;  %v362_v5 = vadd.s32 160, %v4138_v48  ;;  %v880_v49 = vrot.slane %v4458_v6, 7 }
  0x6b   : > { %v882_v1 = vrot.slane %v4691_v21, 7  ;;  %vm4802_vm4 = vcmp.gt.s32.totalorder %v504_v35, 0  ;;  %v859_v55 = vsel %vm822_vm3, %v856_v45, %v858_v2  ;;  %v364_v61 = vadd.s32 176, %v4138_v48  ;;  %v5288_v35 = vld [vmem:[#allocation6_spill] sm:$0xff] }
  0x6c   : > { %3474 = vmatmul.mubr.msk.bf16.gmra.mrb[8].mxu1 %vm1152_vm1, %v4624_v38  ;;  %v588_v36 = vand.u32 15, %v372_v29  ;;  %v857_v7 = vsel %vm822_vm3, %v854_v43, %v856_v45  ;;  %v935_v12 = vsel %vm4793_vm2, %v855_v41, 0.0  ;;  %v884_v57 = vrot.slane %v4707_v47, 7 }
  0x6d   : > { %3626 = vmatmul.mubr.msk.bf16.gmra.mrb[24].mxu0 %vm1152_vm1, %v4766_v4  ;;  %3477 = vmatprep.mubr.msk.bf16.mxu1 %vm1152_vm1, %v4768_v63  ;;  %v883_v23 = vsel %vm822_vm3, %v880_v49, %v882_v1  ;;  %v861_v39 = vsel %vm822_vm3, %v858_v2, %v860_v15  ;;  %v862_v9 = vrot.slane %v4353_v60, 7  ;;  %v4825_v26 = vpack.c.bf16 %v4707_v47, %v4691_v21  ;;  %v5300_v2 = vld [vmem:[#allocation24_spill] sm:$0xff] }
  0x6e   : > { %3629 = vmatprep.mubr.msk.bf16.mxu0 %vm1152_vm1, %v4771_v24  ;;  %vm788_vm5 = vcmp.gt.s32.totalorder %v588_v36, 0  ;;  %v937_v46 = vsel %vm4802_vm4, %v859_v55, 0.0  ;;  %v518_v18 = vand.u32 15, %v362_v5  ;;  %v885_v11 = vsel %vm822_vm3, %v882_v1, %v884_v57  ;;  %v5291_v1 = vld [vmem:[#allocation17_spill] sm:$0xff] }
  0x6f   : > { %v949_v42 = vsel %vm788_vm5, %v883_v23, 0.0  ;;  %v532_v0 = vand.u32 15, %v364_v61  ;;  %v866_v17 = vrot.slane %v4407_v31, 7  ;;  %v4835_v60 = vpack.c.bf16 %v857_v7, %v935_v12 }
  0x70   : > { %v4833_v53 = vpack.c.bf16 %v885_v11, %v949_v42  ;;  %v4837_v43 = vpack.c.bf16 %v861_v39, %v937_v46  ;;  %v864_v21 = vrot.slane %v4355_v56, 7  ;;  %vm4840_vm6 = vcmp.gt.s32.totalorder %v518_v18, 0 }
  0x71   : > { %v863_v20 = vsel %vm822_vm3, %v860_v15, %v862_v9  ;;  %v868_v50 = vrot.slane %v4428_v27, 7  ;;  %v366_v44 = vadd.s32 192, %v4138_v48  ;;  %v2640_v31 = vsel %vm1201_vm0, %v5288_v35, 0  ;;  %v4860_v27 = vld [vmem:[%s5168_s3 + $0x10] sm:$0x3] }
  0x72   : > { %vm4849_vm7 = vcmp.gt.s32.totalorder %v532_v0, 0  ;;  %v867_v41 = vsel %vm822_vm3, %v864_v21, %v866_v17  ;;  %v368_v56 = vadd.s32 208, %v4138_v48  ;;  %v865_v45 = vsel %vm822_vm3, %v862_v9, %v864_v21  ;;  %v5298_v35 = vld [vmem:[#allocation20_spill] sm:$0xff] }
  0x73   : > { %v939_v14 = vsel %vm4840_vm6, %v863_v20, 0.0  ;;  %v869_v15 = vsel %vm822_vm3, %v866_v17, %v868_v50  ;;  %v941_v29 = vsel %vm4849_vm7, %v867_v41, 0.0  ;;  %v546_v5 = vand.u32 15, %v366_v44  ;;  %v5295_v20 = vld [vmem:[#allocation13_spill] sm:$0xff]  ;;  %v5297_v44 = vld [vmem:[#allocation18_spill] sm:$0xff]  ;;  %v5301_v41 = vld [vmem:[#allocation3_spill] sm:$0xff] }
  0x74   : > { %3478 = vmatmul.mubr.msk.bf16.gmra.mrb[12].mxu1 %vm1152_vm1, %v4689_v59  ;;  %v870_v3 = vrot.slane %v5291_v1, 7  ;;  %v560_v55 = vand.u32 15, %v368_v56  ;;  %v874_v61 = vrot.slane %v4452_v8, 7  ;;  %v4878_v36 = vpack.c.bf16 %v865_v45, %v939_v14  ;;  %v5302_v45 = vld [vmem:[#allocation4_spill] sm:$0xff]  ;;  %v5303_v14 = vld [vmem:[#allocation5_spill] sm:$0xff] }
  0x75   : > { %3630 = vmatmul.mubr.msk.bf16.gmra.mrb[28].mxu0 %vm1152_vm1, %v4760_v13  ;;  %3481 = vmatprep.mubr.msk.bf16.mxu1 %vm1152_vm1, %v4791_v30  ;;  %v4880_v7 = vpack.c.bf16 %v869_v15, %v941_v29  ;;  %v872_v12 = vrot.slane %v4439_v37, 7  ;;  %vm4883_vm8 = vcmp.gt.s32.totalorder %v546_v5, 0  ;;  %v876_v39 = vrot.slane %v4454_v32, 7  ;;  %v5304_v15 = vld [vmem:[#allocation7_spill] sm:$0xff]  ;;  %v5306_v29 = vld [vmem:[#allocation9_spill] sm:$0xff]  ;;  %v5307_v5 = vld [vmem:[#allocation10_spill] sm:$0xff] }
  0x76   : > { %3635 = vmatprep.mubr.msk.bf16.mxu0 %vm1152_vm1, %v4638_v58  ;;  %v871_v57 = vsel %vm822_vm3, %v868_v50, %v870_v3  ;;  %v370_v9 = vadd.s32 224, %v4138_v48  ;;  %vm784_vm9 = vcmp.gt.s32.totalorder %v560_v55, 0  ;;  %v878_v11 = vrot.slane %v4456_v51, 7  ;;  %v4016_v50 = vld [vmem:[%s5168_s3 + $0x8] sm:$0xf]  ;;  %v5308_v1 = vld [vmem:[#allocation12_spill] sm:$0xff] }
  0x77   : > { %v875_v8 = vsel %vm822_vm3, %v872_v12, %v874_v61  ;;  %v873_v37 = vsel %vm822_vm3, %v870_v3, %v872_v12  ;;  %v943_v46 = vsel %vm4883_vm8, %v871_v57, 0.0  ;;  %v877_v48 = vsel %vm822_vm3, %v874_v61, %v876_v39  ;;  %v5309_v3 = vld [vmem:[#allocation14_spill] sm:$0xff]  ;;  %v5311_v61 = vld [vmem:[#allocation15_spill] sm:$0xff] }
  0x78   : > { %v945_v32 = vsel %vm784_vm9, %v875_v8, 0.0  ;;  %v574_v18 = vand.u32 15, %v370_v9  ;;  %v4904_v42 = vpack.c.bf16 %v873_v37, %v943_v46  ;;  %v879_v17 = vsel %vm822_vm3, %v876_v39, %v878_v11  ;;  %v5310_v55 = vld [vmem:[#allocation2_spill] sm:$0xff]  ;;  %v5312_v12 = vld [vmem:[#allocation19_spill] sm:$0xff] }
  0x79   : > { %v4906_v0 = vpack.c.bf16 %v877_v48, %v945_v32  ;;  %v881_v51 = vsel %vm822_vm3, %v878_v11, %v880_v49  ;;  %v1840_v6 = vsel %vm1201_vm0, %v4535_v16, 0  ;;  %v5294_v49 = vld [vmem:[#allocation11_spill] sm:$0xff]  ;;  %v5296_v16 = vld [vmem:[#allocation16_spill] sm:$0xff]  ;;  %v2836_v56 = vsel %vm1201_vm0, %v4860_v27, 0 }
  0x7a   : > { %vm786_vm10 = vcmp.gt.s32.totalorder %v574_v18, 0 }
  0x7b   : > { %v947_v21 = vsel %vm786_vm10, %v879_v17, 0.0 }
  0x7c   : > { %3482 = vmatmul.mubr.msk.bf16.gmra.mrb[16].mxu1 %vm1152_vm1, %v4835_v60  ;;  %v4920_v47 = vpack.c.bf16 %v881_v51, %v947_v21 }
  0x7d   : > { %3636 = vmatmul.mubr.msk.bf16.vlgmr.msra.gmra.mrb[0].mxu0 %vm1152_vm1, %v4561_v34  ;;  %3485 = vmatprep.mubr.msk.bf16.mxu1 %vm1152_vm1, %v4837_v43 }
  0x7e   : > { %3668 = vmatpush3.bf16.msra.mxu0 %v2640_v31  ;;  %3639 = vmatprep.mubr.msk.bf16.mxu0 %vm1152_vm1, %v4711_v62  ;;  %v5299_v31 = vld [vmem:[#allocation22_spill] sm:$0xff] }
  0x7f   : > { %4002 = vmatprep.subr.msk.bf16.mxu0 %vm1201_vm0, %v4860_v27  ;;  %v5305_v27 = vld [vmem:[#allocation8_spill] sm:$0xff] }
  0x84   : > { %3486 = vmatmul.mubr.msk.bf16.gmra.mrb[20].mxu1 %vm1152_vm1, %v4878_v36 }
  0x85   : > { %3640 = vmatmul.mubr.msk.bf16.gmra.mrb[4].mxu0 %vm1152_vm1, %v4624_v38  ;;  %3489 = vmatprep.mubr.msk.bf16.mxu1 %vm1152_vm1, %v4880_v7 }
  0x86   : > { %3643 = vmatprep.mubr.msk.bf16.mxu0 %vm1152_vm1, %v4768_v63 }
  0x8c   : > { %3490 = vmatmul.mubr.msk.bf16.gmra.mrb[24].mxu1 %vm1152_vm1, %v4904_v42 }
  0x8d   : > { %3644 = vmatmul.mubr.msk.bf16.gmra.mrb[8].mxu0 %vm1152_vm1, %v4689_v59  ;;  %3493 = vmatprep.mubr.msk.bf16.mxu1 %vm1152_vm1, %v4906_v0 }
  0x8e   : > { %3647 = vmatprep.mubr.msk.bf16.mxu0 %vm1152_vm1, %v4791_v30 }
  0x94   : > { %3494 = vmatmul.mubr.msk.bf16.gmra.mrb[28].mxu1 %vm1152_vm1, %v4920_v47 }
  0x95   : > { %3648 = vmatmul.mubr.msk.bf16.gmra.mrb[12].mxu0 %vm1152_vm1, %v4835_v60  ;;  %3499 = vmatprep.mubr.bf16.mxu1 %v5266_v19 }
  0x96   : > { %3651 = vmatprep.mubr.msk.bf16.mxu0 %vm1152_vm1, %v4837_v43 }
  0x9c   : > { %3500 = vmatmul.mubr.msk.bf16.vlgmr.msra.gmra.mrb[0].mxu1 %vm1152_vm1, %v5294_v49 }
  0x9d   : > { %3532 = vmatpush3.bf16.msra.mxu1 %v1840_v6  ;;  %3652 = vmatmul.mubr.msk.bf16.gmra.mrb[16].mxu0 %vm1152_vm1, %v4878_v36 }
  0x9e   : > { %3503 = vmatprep.mubr.msk.bf16.mxu1 %vm1152_vm1, %v5295_v20  ;;  %3655 = vmatprep.mubr.msk.bf16.mxu0 %vm1152_vm1, %v4880_v7 }
  0x9f   : > { %3998 = vmatprep.subr.msk.bf16.mxu1 %vm1201_vm0, %v4016_v50  ;;  %vm3031_vm0 = vcmask 64512  }
  0xa4   : > { %3504 = vmatmul.mubr.msk.bf16.gmra.mrb[4].mxu1 %vm1152_vm1, %v5296_v16 }
  0xa5   : > { %3656 = vmatmul.mubr.msk.bf16.gmra.mrb[20].mxu0 %vm1152_vm1, %v4904_v42  ;;  %3507 = vmatprep.mubr.msk.bf16.mxu1 %vm1152_vm1, %v5297_v44 }
  0xa6   : > { %3659 = vmatprep.mubr.msk.bf16.mxu0 %vm1152_vm1, %v4906_v0 }
  0xac   : > { %3508 = vmatmul.mubr.msk.bf16.gmra.mrb[8].mxu1 %vm1152_vm1, %v5298_v35 }
  0xad   : > { %3660 = vmatmul.mubr.msk.bf16.gmra.mrb[24].mxu0 %vm1152_vm1, %v4920_v47  ;;  %3511 = vmatprep.mubr.msk.bf16.mxu1 %vm1152_vm1, %v5299_v31 }
  0xae   : > { %3663 = vmatprep.mubr.msk.bf16.mxu0 %vm1152_vm1, %v4833_v53 }
  0xb4   : > { %3512 = vmatmul.mubr.msk.bf16.gmra.mrb[12].mxu1 %vm1152_vm1, %v5300_v2 }
  0xb5   : > { %3664 = vmatmul.mubr.bf16.gmra.mrb[28].mxu0 %v5266_v19  ;;  %3515 = vmatprep.mubr.msk.bf16.mxu1 %vm1152_vm1, %v4565_v22 }
  0xb6   : > { %3669 = vmatprep.mubr.msk.bf16.mxu0 %vm1152_vm1, %v5301_v41 }
  0xbc   : > { %3516 = vmatmul.mubr.msk.bf16.gmra.mrb[16].mxu1 %vm1152_vm1, %v4607_v54 }
  0xbd   : > { %3670 = vmatmul.mubr.msk.bf16.vlgmr.msra.gmra.mrb[0].mxu0 %vm1152_vm1, %v5302_v45  ;;  %3519 = vmatprep.mubr.msk.bf16.mxu1 %vm1152_vm1, %v4629_v28 }
  0xbe   : > { %3702 = vmatpush3.bf16.msra.mxu0 %v2836_v56  ;;  %3673 = vmatprep.mubr.msk.bf16.mxu0 %vm1152_vm1, %v5303_v14 }
  0xc4   : > { %3520 = vmatmul.mubr.msk.bf16.gmra.mrb[20].mxu1 %vm1152_vm1, %v4644_v52 }
  0xc5   : > { %3674 = vmatmul.mubr.msk.bf16.gmra.mrb[4].mxu0 %vm1152_vm1, %v5304_v15  ;;  %3523 = vmatprep.mubr.msk.bf16.mxu1 %vm1152_vm1, %v4709_v10 }
  0xc6   : > { %3677 = vmatprep.mubr.msk.bf16.mxu0 %vm1152_vm1, %v5305_v27 }
  0xcc   : > { %3524 = vmatmul.mubr.msk.bf16.gmra.mrb[24].mxu1 %vm1152_vm1, %v4713_v40 }
  0xcd   : > { %3678 = vmatmul.mubr.msk.bf16.gmra.mrb[8].mxu0 %vm1152_vm1, %v5306_v29  ;;  %3527 = vmatprep.mubr.msk.bf16.mxu1 %vm1152_vm1, %v4766_v4 }
  0xce   : > { %3681 = vmatprep.mubr.msk.bf16.mxu0 %vm1152_vm1, %v5307_v5 }
  0xd4   : > { %3528 = vmatmul.mubr.msk.bf16.gmra.mrb[28].mxu1 %vm1152_vm1, %v4771_v24 }
  0xd5   : > { %3682 = vmatmul.mubr.msk.bf16.gmra.mrb[12].mxu0 %vm1152_vm1, %v5308_v1  ;;  %3533 = vmatprep.mubr.msk.bf16.mxu1 %vm1152_vm1, %v4547_v25  ;;  %v5313_v25 = vld [vmem:[#allocation21_spill] sm:$0xff] }
  0xd6   : > { %3685 = vmatprep.mubr.msk.bf16.mxu0 %vm1152_vm1, %v5309_v3 }
  0xdc   : > { %3534 = vmatmul.mubr.msk.bf16.vlgmr.msra.gmra.mrb[0].mxu1 %vm1152_vm1, %v4638_v58  ;;  %v5314_v58 = vld [vmem:[#allocation23_spill] sm:$0xff] }
  0xdd   : > { %3736 = vmatpush3.bf16.msra.mxu1 %v5310_v55  ;;  %3686 = vmatmul.mubr.msk.bf16.gmra.mrb[16].mxu0 %vm1152_vm1, %v5311_v61 }
  0xde   : > { %3537 = vmatprep.mubr.msk.bf16.mxu1 %vm1152_vm1, %v4561_v34  ;;  %3689 = vmatprep.mubr.msk.bf16.mxu0 %vm1152_vm1, %v5312_v12 }
  0xe4   : > { %3538 = vmatmul.mubr.msk.bf16.gmra.mrb[4].mxu1 %vm1152_vm1, %v4711_v62 }
  0xe5   : > { %3690 = vmatmul.mubr.msk.bf16.gmra.mrb[20].mxu0 %vm1152_vm1, %v5313_v25  ;;  %3541 = vmatprep.mubr.msk.bf16.mxu1 %vm1152_vm1, %v4624_v38 }
  0xe6   : > { %3693 = vmatprep.mubr.msk.bf16.mxu0 %vm1152_vm1, %v5314_v58 }
  0xec   : > { %3542 = vmatmul.mubr.msk.bf16.gmra.mrb[8].mxu1 %vm1152_vm1, %v4768_v63 }
  0xed   : > { %3694 = vmatmul.mubr.msk.bf16.gmra.mrb[24].mxu0 %vm1152_vm1, %v4493_v33  ;;  %3545 = vmatprep.mubr.msk.bf16.mxu1 %vm1152_vm1, %v4689_v59 }
  0xee   : > { %3697 = vmatprep.mubr.msk.bf16.mxu0 %vm1152_vm1, %v4825_v26 }
  0xf4   : > { %3546 = vmatmul.mubr.msk.bf16.gmra.mrb[12].mxu1 %vm1152_vm1, %v4791_v30 }
  0xf5   : > { %3698 = vmatmul.mubr.bf16.gmra.mrb[28].mxu0 %v5266_v19  ;;  %3549 = vmatprep.mubr.msk.bf16.mxu1 %vm1152_vm1, %v4835_v60 }
  0xf6   : > { %3703 = vmatprep.mubr.msk.bf16.mxu0 %vm1152_vm1, %v5295_v20 }
  0xfc   : > { %3550 = vmatmul.mubr.msk.bf16.gmra.mrb[16].mxu1 %vm1152_vm1, %v4837_v43 }
  0xfd   : > { %3704 = vmatmul.mubr.msk.bf16.vlgmr.msra.gmra.mrb[0].mxu0 %vm1152_vm1, %v5296_v16  ;;  %3553 = vmatprep.mubr.msk.bf16.mxu1 %vm1152_vm1, %v4878_v36 }
  0xfe   : > { %3707 = vmatprep.mubr.msk.bf16.mxu0 %vm1152_vm1, %v5297_v44 }
 0x104   : > { %3554 = vmatmul.mubr.msk.bf16.gmra.mrb[20].mxu1 %vm1152_vm1, %v4880_v7 }
 0x105   : > { %3708 = vmatmul.mubr.msk.bf16.gmra.mrb[4].mxu0 %vm1152_vm1, %v5298_v35  ;;  %3557 = vmatprep.mubr.msk.bf16.mxu1 %vm1152_vm1, %v4904_v42 }
 0x106   : > { %3711 = vmatprep.mubr.msk.bf16.mxu0 %vm1152_vm1, %v5299_v31 }
 0x10c   : > { %3558 = vmatmul.mubr.msk.bf16.gmra.mrb[24].mxu1 %vm1152_vm1, %v4906_v0 }
 0x10d   : > { %3712 = vmatmul.mubr.msk.bf16.gmra.mrb[8].mxu0 %vm1152_vm1, %v5300_v2  ;;  %3561 = vmatprep.mubr.msk.bf16.mxu1 %vm1152_vm1, %v4920_v47 }
 0x10e   : > { %3715 = vmatprep.mubr.msk.bf16.mxu0 %vm1152_vm1, %v4565_v22 }
 0x114   : > { %3562 = vmatmul.mubr.msk.bf16.gmra.mrb[28].mxu1 %vm1152_vm1, %v4833_v53 }
 0x115   : > { %3716 = vmatmul.mubr.msk.bf16.gmra.mrb[12].mxu0 %vm1152_vm1, %v4607_v54  ;;  %3583 = vmatprep.mubr.msk.bf16.mxu1 %vm1152_vm1, %v5308_v1 }
 0x116   : > { %3719 = vmatprep.mubr.msk.bf16.mxu0 %vm1152_vm1, %v4629_v28 }
 0x11c   : > { %3584 = vmatmul.mubr.msk.bf16.vlgmr.msra.gmra.mrb[16].mxu1 %vm1152_vm1, %v5309_v3 }
 0x11d   : > { %3720 = vmatmul.mubr.msk.bf16.gmra.mrb[16].mxu0 %vm1152_vm1, %v4644_v52  ;;  %3587 = vmatprep.mubr.msk.bf16.mxu1 %vm1152_vm1, %v5311_v61 }
 0x11e   : > { %3723 = vmatprep.mubr.msk.bf16.mxu0 %vm1152_vm1, %v4709_v10 }
 0x124   : > { %3588 = vmatmul.mubr.msk.bf16.gmra.mrb[20].mxu1 %vm1152_vm1, %v5312_v12 }
 0x125   : > { %3724 = vmatmul.mubr.msk.bf16.gmra.mrb[20].mxu0 %vm1152_vm1, %v4713_v40  ;;  %3591 = vmatprep.mubr.msk.bf16.mxu1 %vm1152_vm1, %v5313_v25 }
 0x126   : > { %3727 = vmatprep.mubr.msk.bf16.mxu0 %vm1152_vm1, %v4766_v4 }
 0x12c   : > { %3592 = vmatmul.mubr.msk.bf16.gmra.mrb[24].mxu1 %vm1152_vm1, %v5314_v58 }
 0x12d   : > { %3728 = vmatmul.mubr.msk.bf16.gmra.mrb[24].mxu0 %vm1152_vm1, %v4771_v24  ;;  %3595 = vmatprep.mubr.msk.bf16.mxu1 %vm1152_vm1, %v4493_v33 }
 0x12e   : > { %3731 = vmatprep.mubr.msk.bf16.mxu0 %vm1152_vm1, %v4760_v13 }
 0x134   : > { %3596 = vmatmul.mubr.msk.bf16.gmra.mrb[28].mxu1 %vm1152_vm1, %v4825_v26 }
 0x135   : > { %3732 = vmatmul.mubr.bf16.gmra.mrb[28].mxu0 %v5266_v19 }
 0x1af   : > { %v3535_v54 = vpop.f32.mrb[0].mxu1 }
 0x1b0   : > { %v1876_v34 = vpop.f32.mrb[1].mxu1 }
 0x1b1   : > { %v3536_v22 = vpop.f32.mrb[2].mxu1 }
 0x1b2   : > { %v1879_v38 = vpop.f32.mrb[3].mxu1 }
 0x1b7   : > { %v3539_v28 = vpop.f32.mrb[4].mxu1 }
 0x1b8   : > { %v1892_v52 = vpop.f32.mrb[5].mxu1 }
 0x1b9   : > { %v3540_v59 = vpop.f32.mrb[6].mxu1 }
 0x1ba   : > { %v1895_v10 = vpop.f32.mrb[7].mxu1 }
 0x1bf   : > { %v3543_v62 = vpop.f32.mrb[8].mxu1 }
 0x1c0   : > { %v1908_v40 = vpop.f32.mrb[9].mxu1 }
 0x1c1   : > { %v3544_v33 = vpop.f32.mrb[10].mxu1 }
 0x1c2   : > { %v1911_v4 = vpop.f32.mrb[11].mxu1 }
 0x1c7   : > { %v3547_v63 = vpop.f32.mrb[12].mxu1 }
 0x1c8   : > { %v1924_v13 = vpop.f32.mrb[13].mxu1 }
 0x1c9   : > { %v3548_v24 = vpop.f32.mrb[14].mxu1 }
 0x1ca   : > { %v1927_v30 = vpop.f32.mrb[15].mxu1 }
 0x1d0   : > { %v3705_v19 = vpop.f32.mrb[0].mxu0 }
 0x1d1   : > { %v3737_v26 = vadd.f32 %v3705_v19, %v3535_v54  ;;  %v2872_v53 = vpop.f32.mrb[1].mxu0 }
 0x1d2   : > { %v3738_v60 = vadd.f32 %v2872_v53, %v1876_v34  ;;  %v3706_v43 = vpop.f32.mrb[2].mxu0 }
 0x1d3   : > { %3034 = vst.msk [vmem:[%s5096_s13 + $0x10] sm:$0xff] %vm3031_vm0, %v3737_v26  ;;  %v3739_v36 = vadd.f32 %v3706_v43, %v3536_v22  ;;  %v2875_v7 = vpop.f32.mrb[3].mxu0 }
 0x1d4   : > { %3032 = vst.msk [vmem:[%s5096_s13] sm:$0xff] %vm3031_vm0, %v3738_v60  ;;  %v3740_v23 = vadd.f32 %v2875_v7, %v1879_v38 }
 0x1d5   : > { %3035 = vst.msk [vmem:[%s5096_s13 + $0x18] sm:$0xff] %vm3031_vm0, %v3739_v36 }
 0x1d6   : > { %3033 = vst.msk [vmem:[%s5096_s13 + $0x8] sm:$0xff] %vm3031_vm0, %v3740_v23 }
 0x1d8   : > { %v3709_v57 = vpop.f32.mrb[4].mxu0 }
 0x1d9   : > { %v3741_v39 = vadd.f32 %v3709_v57, %v3539_v28  ;;  %v2888_v9 = vpop.f32.mrb[5].mxu0 }
 0x1da   : > { %v3742_v8 = vadd.f32 %v2888_v9, %v1892_v52  ;;  %v3710_v37 = vpop.f32.mrb[6].mxu0 }
 0x1db   : > { %3038 = vst.msk [vmem:[%s5096_s13 + $0x30] sm:$0xff] %vm3031_vm0, %v3741_v39  ;;  %v3743_v46 = vadd.f32 %v3710_v37, %v3540_v59  ;;  %v2891_v48 = vpop.f32.mrb[7].mxu0 }
 0x1dc   : > { %3036 = vst.msk [vmem:[%s5096_s13 + $0x20] sm:$0xff] %vm3031_vm0, %v3742_v8  ;;  %v3744_v32 = vadd.f32 %v2891_v48, %v1895_v10 }
 0x1dd   : > { %3039 = vst.msk [vmem:[%s5096_s13 + $0x38] sm:$0xff] %vm3031_vm0, %v3743_v46 }
 0x1de   : > { %3037 = vst.msk [vmem:[%s5096_s13 + $0x28] sm:$0xff] %vm3031_vm0, %v3744_v32 }
 0x1e0   : > { %v3713_v18 = vpop.f32.mrb[8].mxu0 }
 0x1e1   : > { %v3745_v11 = vadd.f32 %v3713_v18, %v3543_v62  ;;  %v2904_v42 = vpop.f32.mrb[9].mxu0 }
 0x1e2   : > { %v3746_v0 = vadd.f32 %v2904_v42, %v1908_v40  ;;  %v3714_v17 = vpop.f32.mrb[10].mxu0 }
 0x1e3   : > { %3042 = vst.msk [vmem:[%s5096_s13 + $0x50] sm:$0xff] %vm3031_vm0, %v3745_v11  ;;  %v3747_v51 = vadd.f32 %v3714_v17, %v3544_v33  ;;  %v2907_v21 = vpop.f32.mrb[11].mxu0 }
 0x1e4   : > { %3040 = vst.msk [vmem:[%s5096_s13 + $0x40] sm:$0xff] %vm3031_vm0, %v3746_v0  ;;  %v3748_v47 = vadd.f32 %v2907_v21, %v1911_v4 }
 0x1e5   : > { %3043 = vst.msk [vmem:[%s5096_s13 + $0x58] sm:$0xff] %vm3031_vm0, %v3747_v51 }
 0x1e6   : > { %3041 = vst.msk [vmem:[%s5096_s13 + $0x48] sm:$0xff] %vm3031_vm0, %v3748_v47 }
 0x1e8   : > { %v3717_v6 = vpop.f32.mrb[12].mxu0 }
 0x1e9   : > { %v3749_v49 = vadd.f32 %v3717_v6, %v3547_v63  ;;  %v2920_v20 = vpop.f32.mrb[13].mxu0 }
 0x1ea   : > { %v3750_v50 = vadd.f32 %v2920_v20, %v1924_v13  ;;  %v3718_v16 = vpop.f32.mrb[14].mxu0 }
 0x1eb   : > { %3046 = vst.msk [vmem:[%s5096_s13 + $0x70] sm:$0xff] %vm3031_vm0, %v3749_v49  ;;  %v3751_v44 = vadd.f32 %v3718_v16, %v3548_v24  ;;  %v2923_v35 = vpop.f32.mrb[15].mxu0 }
 0x1ec   : > { %3044 = vst.msk [vmem:[%s5096_s13 + $0x60] sm:$0xff] %vm3031_vm0, %v3750_v50  ;;  %v3752_v31 = vadd.f32 %v2923_v35, %v1927_v30 }
 0x1ed   : > { %3047 = vst.msk [vmem:[%s5096_s13 + $0x78] sm:$0xff] %vm3031_vm0, %v3751_v44 }
 0x1ee   : > { %3045 = vst.msk [vmem:[%s5096_s13 + $0x68] sm:$0xff] %vm3031_vm0, %v3752_v31 }
 0x1ef   : > { %v3585_v2 = vpop.f32.mrb[16].mxu1 }
 0x1f0   : > { %v2140_v41 = vpop.f32.mrb[17].mxu1  ;;  %v3721_v56 = vpop.f32.mrb[16].mxu0 }
 0x1f1   : > { %v3753_v45 = vadd.f32 %v3721_v56, %v3585_v2  ;;  %v3586_v14 = vpop.f32.mrb[18].mxu1  ;;  %v2936_v15 = vpop.f32.mrb[17].mxu0 }
 0x1f2   : > { %v3754_v27 = vadd.f32 %v2936_v15, %v2140_v41  ;;  %v2143_v29 = vpop.f32.mrb[19].mxu1  ;;  %v3722_v5 = vpop.f32.mrb[18].mxu0 }
 0x1f3   : > { %3050 = vst.msk [vmem:[%s5096_s13 + $0x90] sm:$0xff] %vm3031_vm0, %v3753_v45  ;;  %v3755_v1 = vadd.f32 %v3722_v5, %v3586_v14  ;;  %v2939_v3 = vpop.f32.mrb[19].mxu0 }
 0x1f4   : > { %3048 = vst.msk [vmem:[%s5096_s13 + $0x80] sm:$0xff] %vm3031_vm0, %v3754_v27  ;;  %v3756_v55 = vadd.f32 %v2939_v3, %v2143_v29 }
 0x1f5   : > { %3051 = vst.msk [vmem:[%s5096_s13 + $0x98] sm:$0xff] %vm3031_vm0, %v3755_v1 }
 0x1f6   : > { %3049 = vst.msk [vmem:[%s5096_s13 + $0x88] sm:$0xff] %vm3031_vm0, %v3756_v55 }
 0x1f7   : > { %v3589_v61 = vpop.f32.mrb[20].mxu1 }
 0x1f8   : > { %v2156_v12 = vpop.f32.mrb[21].mxu1  ;;  %v3725_v25 = vpop.f32.mrb[20].mxu0 }
 0x1f9   : > { %v3757_v58 = vadd.f32 %v3725_v25, %v3589_v61  ;;  %v3590_v54 = vpop.f32.mrb[22].mxu1  ;;  %v2952_v34 = vpop.f32.mrb[21].mxu0 }
 0x1fa   : > { %v3758_v22 = vadd.f32 %v2952_v34, %v2156_v12  ;;  %v2159_v38 = vpop.f32.mrb[23].mxu1  ;;  %v3726_v28 = vpop.f32.mrb[22].mxu0 }
 0x1fb   : > { %3054 = vst.msk [vmem:[%s5096_s13 + $0xb0] sm:$0xff] %vm3031_vm0, %v3757_v58  ;;  %v3759_v52 = vadd.f32 %v3726_v28, %v3590_v54  ;;  %v2955_v59 = vpop.f32.mrb[23].mxu0 }
 0x1fc   : > { %3052 = vst.msk [vmem:[%s5096_s13 + $0xa0] sm:$0xff] %vm3031_vm0, %v3758_v22  ;;  %v3760_v10 = vadd.f32 %v2955_v59, %v2159_v38 }
 0x1fd   : > { %3055 = vst.msk [vmem:[%s5096_s13 + $0xb8] sm:$0xff] %vm3031_vm0, %v3759_v52 }
 0x1fe   : > { %3053 = vst.msk [vmem:[%s5096_s13 + $0xa8] sm:$0xff] %vm3031_vm0, %v3760_v10 }
 0x1ff   : > { %v3593_v62 = vpop.f32.mrb[24].mxu1 }
 0x200   : > { %v2172_v40 = vpop.f32.mrb[25].mxu1  ;;  %v3729_v33 = vpop.f32.mrb[24].mxu0 }
 0x201   : > { %v3761_v4 = vadd.f32 %v3729_v33, %v3593_v62  ;;  %v3594_v63 = vpop.f32.mrb[26].mxu1  ;;  %v2968_v13 = vpop.f32.mrb[25].mxu0 }
 0x202   : > { %v3762_v24 = vadd.f32 %v2968_v13, %v2172_v40  ;;  %v2175_v30 = vpop.f32.mrb[27].mxu1  ;;  %v3730_v19 = vpop.f32.mrb[26].mxu0 }
 0x203   : > { %3058 = vst.msk [vmem:[%s5096_s13 + $0xd0] sm:$0xff] %vm3031_vm0, %v3761_v4  ;;  %v3763_v26 = vadd.f32 %v3730_v19, %v3594_v63  ;;  %v2971_v53 = vpop.f32.mrb[27].mxu0 }
 0x204   : > { %3056 = vst.msk [vmem:[%s5096_s13 + $0xc0] sm:$0xff] %vm3031_vm0, %v3762_v24  ;;  %v3764_v60 = vadd.f32 %v2971_v53, %v2175_v30 }
 0x205   : > { %3059 = vst.msk [vmem:[%s5096_s13 + $0xd8] sm:$0xff] %vm3031_vm0, %v3763_v26 }
 0x206   : > { %3057 = vst.msk [vmem:[%s5096_s13 + $0xc8] sm:$0xff] %vm3031_vm0, %v3764_v60 }
 0x207   : > { %v3597_v43 = vpop.f32.mrb[28].mxu1 }
 0x208   : > { %v2188_v36 = vpop.f32.mrb[29].mxu1  ;;  %v3733_v7 = vpop.f32.mrb[28].mxu0 }
 0x209   : > { %v3765_v23 = vadd.f32 %v3733_v7, %v3597_v43  ;;  %v3598_v57 = vpop.f32.mrb[30].mxu1  ;;  %v2984_v39 = vpop.f32.mrb[29].mxu0 }
 0x20a   : > { %v3766_v9 = vadd.f32 %v2984_v39, %v2188_v36  ;;  %v2191_v8 = vpop.f32.mrb[31].mxu1  ;;  %v3734_v37 = vpop.f32.mrb[30].mxu0 }
 0x20b   : > { %3062 = vst.msk [vmem:[%s5096_s13 + $0xf0] sm:$0xff] %vm3031_vm0, %v3765_v23  ;;  %v3767_v46 = vadd.f32 %v3734_v37, %v3598_v57  ;;  %v2987_v48 = vpop.f32.mrb[31].mxu0 }
 0x20c   : > { %3060 = vst.msk [vmem:[%s5096_s13 + $0xe0] sm:$0xff] %vm3031_vm0, %v3766_v9  ;;  %v3768_v32 = vadd.f32 %v2987_v48, %v2191_v8 }
 0x20d   : > { %3063 = vst.msk [vmem:[%s5096_s13 + $0xf8] sm:$0xff] %vm3031_vm0, %v3767_v46 }
 0x20e   : > { %3061 = vst.msk [vmem:[%s5096_s13 + $0xe8] sm:$0xff] %vm3031_vm0, %v3768_v32 }
 0x20f PF: > { %s14_s15 = sadd.s32 1, %s4023_s15  }
 0x210   : > { %p11_p4 = scmp.ge.s32.totalorder %s14_s15, 4  }
 0x212   :  { %13 = sbr.rel (!%p11_p4) target bundleno = 1 (0x1), region = 66 }

</bundles_post_ra>
